<compile_context>
chip_gen: v7x
topology: tpu7x:2x2x1
jax: 0.10.0
libtpu: 0.0.40
codegen_flags: <defaults>
</compile_context>

<pallas_src>
import jax
import jax.numpy as jnp
from jax.experimental import pallas as pl
from jax.experimental.pallas import tpu as pltpu

IN_FEATURES = 28 * 28   # 784 (kept un-padded: Mosaic handles K=784 on the MXU)
HIDDEN = 512
N_CLASSES = 10
N_PAD = 128             # padded class dim (lane-dense stores, full-width fc3 matmul)


def _round_up(x, m):
    return (x + m - 1) // m * m


def _choose_batch_tile(B, batch_tile):
    """Pick the batch tile TB and padded batch Bp."""
    Bp0 = _round_up(B, 16)
    TB = min(_round_up(batch_tile, 16), Bp0)
    # v7x has 2 TensorCores: dimension_semantics=("parallel",) only helps if the grid has
    # >= 2 steps.  Split the batch when each half-tile still keeps the MXU busy (>=256 rows).
    if TB == Bp0 and Bp0 >= 512:
        TB = _round_up((Bp0 + 1) // 2, 16)
    Bp = _round_up(B, TB)
    return TB, Bp


def mnist_mlp_kernel(x_ref, w1_ref, b1_ref, w2_ref, b2_ref, w3_ref, b3_ref, o_ref):
    # x streams in as f32; cast to bf16 in VMEM (VPU has slack, kernel is MXU/mem-bound).
    x = x_ref[...].astype(jnp.bfloat16)
    # fc1 + relu  (bf16 MXU matmul, f32 accumulation / bias / relu)
    h1 = jnp.dot(x, w1_ref[...], preferred_element_type=jnp.float32) + b1_ref[...]
    h1 = jnp.maximum(h1, 0.0).astype(jnp.bfloat16)
    # fc2 + relu
    h2 = jnp.dot(h1, w2_ref[...], preferred_element_type=jnp.float32) + b2_ref[...]
    h2 = jnp.maximum(h2, 0.0).astype(jnp.bfloat16)
    # fc3 + softmax over the (padded) class dim.  Padded bias columns are -1e30 so
    # exp() of padded logits underflows to exactly 0 and the 128-wide sum equals
    # the exact 10-class sum.
    logits = jnp.dot(h2, w3_ref[...], preferred_element_type=jnp.float32) + b3_ref[...]
    m = jnp.max(logits, axis=1, keepdims=True)
    e = jnp.exp(logits - m)
    denom = jnp.sum(e, axis=1, keepdims=True)
    # approx reciprocal runs on the EUP (free slot); rows sum to 1 within ~1e-3.
    o_ref[...] = (e * pl.reciprocal(denom, approx=True)).astype(o_ref.dtype)


def mnist_net(x, params, *, batch_tile=1024):
    """Forward pass of MnistNet. x: anything reshapeable to (-1, 784)."""
    x2 = x.reshape(-1, IN_FEATURES).astype(jnp.float32)
    B = x2.shape[0]
    (w1, b1), (w2, b2), (w3, b3) = params

    TB, Bp = _choose_batch_tile(B, batch_tile)
    if Bp != B:
        # batch-only padding (K stays 784); no-op copy when B is already a tile multiple
        x2 = jnp.pad(x2, ((0, Bp - B), (0, 0)))

    # ---- cast / pad the (tiny) weight set ----
    w1c = w1.astype(jnp.bfloat16)                                   # (784, 512)
    w2c = w2.astype(jnp.bfloat16)                                   # (512, 512)
    w3p = jnp.zeros((HIDDEN, N_PAD), jnp.bfloat16).at[:, :N_CLASSES].set(
        w3.astype(jnp.bfloat16))                                    # (512, 128)
    b1c = b1.reshape(1, HIDDEN).astype(jnp.float32)
    b2c = b2.reshape(1, HIDDEN).astype(jnp.float32)
    # large finite negative (not -inf): exp() underflows to 0, no inf propagation
    b3p = jnp.full((1, N_PAD), -1e30, jnp.float32).at[0, :N_CLASSES].set(
        b3.reshape(-1).astype(jnp.float32))

    grid = (Bp // TB,)
    const = lambda i: (0, 0)   # weights/biases: same block every step -> resident in VMEM

    flops = 2 * Bp * (IN_FEATURES * HIDDEN + HIDDEN * HIDDEN + HIDDEN * N_PAD)
    bytes_accessed = (
        Bp * IN_FEATURES * 4                                                   # x (f32)
        + (IN_FEATURES * HIDDEN + HIDDEN * HIDDEN + HIDDEN * N_PAD) * 2        # weights (bf16)
        + (2 * HIDDEN + N_PAD) * 4                                             # biases (f32)
        + Bp * N_PAD * 2                                                       # output (bf16)
    )

    f = pl.pallas_call(
        mnist_mlp_kernel,
        out_shape=jax.ShapeDtypeStruct((Bp, N_PAD), jnp.bfloat16),
        grid_spec=pltpu.PrefetchScalarGridSpec(
            num_scalar_prefetch=0,
            grid=grid,
            in_specs=[
                pl.BlockSpec((TB, IN_FEATURES), lambda i: (i, 0)),   # x tile (pipelined, f32)
                pl.BlockSpec((IN_FEATURES, HIDDEN), const),          # w1 (resident)
                pl.BlockSpec((1, HIDDEN), const),                    # b1
                pl.BlockSpec((HIDDEN, HIDDEN), const),               # w2
                pl.BlockSpec((1, HIDDEN), const),                    # b2
                pl.BlockSpec((HIDDEN, N_PAD), const),                # w3 (class-padded)
                pl.BlockSpec((1, N_PAD), const),                     # b3 (-1e30 padded)
            ],
            out_specs=pl.BlockSpec((TB, N_PAD), lambda i: (i, 0)),
        ),
        compiler_params=pltpu.CompilerParams(
            dimension_semantics=("parallel",),        # dual-TC sharding on v7x
            vmem_limit_bytes=48 * 1024 * 1024),       # headroom for larger batch tiles
        cost_estimate=pl.CostEstimate(
            flops=flops,
            transcendentals=Bp * N_PAD + Bp,
            bytes_accessed=bytes_accessed),
    )
    out = f(x2, w1c, b1c, w2c, b2c, w3p, b3p)
    return out[:B, :N_CLASSES].astype(jnp.float32)


def init_params(key):
    """Deterministic init mimicking PyTorch's default Linear init U(-1/sqrt(fan_in), +)."""
    def linear(k, fan_in, fan_out):
        kw, kb = jax.random.split(k)
        bound = 1.0 / jnp.sqrt(jnp.float32(fan_in))
        # stored as (in, out) so the kernel does x @ w
        w = jax.random.uniform(kw, (fan_in, fan_out), jnp.float32, -bound, bound)
        b = jax.random.uniform(kb, (1, fan_out), jnp.float32, -bound, bound)
        return w, b

    k1, k2, k3 = jax.random.split(key, 3)
    return (
        linear(k1, IN_FEATURES, HIDDEN),
        linear(k2, HIDDEN, HIDDEN),
        linear(k3, HIDDEN, N_CLASSES),
    )


def reference(x, params):
    """Pure-f32 JAX reference matching PyTorch semantics."""
    x2 = x.reshape(-1, IN_FEATURES).astype(jnp.float32)
    (w1, b1), (w2, b2), (w3, b3) = params
    h1 = jnp.maximum(x2 @ w1 + b1, 0.0)
    h2 = jnp.maximum(h1 @ w2 + b2, 0.0)
    return jax.nn.softmax(h2 @ w3 + b3, axis=1)


if __name__ == "__main__":
    key = jax.random.PRNGKey(0)
    kx, kp = jax.random.split(key)
    # small batch, MNIST-shaped NCHW input, consistent with x.view(-1, 28*28)
    x = jax.random.normal(kx, (2, 1, 28, 28), jnp.float32)
    params = init_params(kp)

    out = mnist_net(x, params)
    out = jax.block_until_ready(out)

    ref = reference(x, params)
    assert out.shape == (2, N_CLASSES)
    assert bool(jnp.all(jnp.isfinite(out)))
    # rows sum to 1 (bf16 output + approx reciprocal tolerance)
    assert jnp.allclose(jnp.sum(out, axis=1), 1.0, atol=1e-2)
    # matches the f32 reference up to bf16-matmul / bf16-output / approx-recip error
    assert jnp.allclose(out, ref, atol=2e-2, rtol=2e-2), float(jnp.max(jnp.abs(out - ref)))
    print("KERNEL_OK")
</pallas_src>

<mosaic_0001>
module attributes {stable_mosaic.version = 11 : i64} {
  func.func @mnist_mlp_kernel(%arg0: i32, %arg1: memref<16x784xf32, #tpu.memory_space<vmem>>, %arg2: memref<784x512xbf16, #tpu.memory_space<vmem>>, %arg3: memref<1x512xf32, #tpu.memory_space<vmem>>, %arg4: memref<512x512xbf16, #tpu.memory_space<vmem>>, %arg5: memref<1x512xf32, #tpu.memory_space<vmem>>, %arg6: memref<512x128xbf16, #tpu.memory_space<vmem>>, %arg7: memref<1x128xf32, #tpu.memory_space<vmem>>, %arg8: memref<16x128xbf16, #tpu.memory_space<vmem>>) attributes {dimension_semantics = [#tpu.dimension_semantics<parallel>], iteration_bounds = array<i64: 1>, scalar_prefetch = 0 : i64, scratch_operands = 0 : i64, tpu.core_type = #tpu.core_type<tc>, window_params = [{transform_indices = @transform_0, window_bounds = array<i64: 16, 784>}, {pipeline_mode = #tpu.pipeline_mode<synchronous>, transform_indices = @transform_1, window_bounds = array<i64: 784, 512>}, {pipeline_mode = #tpu.pipeline_mode<synchronous>, transform_indices = @transform_2, window_bounds = array<i64: 1, 512>}, {pipeline_mode = #tpu.pipeline_mode<synchronous>, transform_indices = @transform_3, window_bounds = array<i64: 512, 512>}, {pipeline_mode = #tpu.pipeline_mode<synchronous>, transform_indices = @transform_4, window_bounds = array<i64: 1, 512>}, {pipeline_mode = #tpu.pipeline_mode<synchronous>, transform_indices = @transform_5, window_bounds = array<i64: 512, 128>}, {pipeline_mode = #tpu.pipeline_mode<synchronous>, transform_indices = @transform_6, window_bounds = array<i64: 1, 128>}, {transform_indices = @transform_7, window_bounds = array<i64: 16, 128>}]} {
    %c0 = arith.constant 0 : index
    %c0_0 = arith.constant 0 : index
    %0 = vector.load %arg1[%c0, %c0_0] : memref<16x784xf32, #tpu.memory_space<vmem>>, vector<16x784xf32>
    %1 = arith.truncf %0 : vector<16x784xf32> to vector<16x784xbf16>
    %c0_1 = arith.constant 0 : index
    %c0_2 = arith.constant 0 : index
    %2 = vector.load %arg2[%c0_1, %c0_2] : memref<784x512xbf16, #tpu.memory_space<vmem>>, vector<784x512xbf16>
    %cst = arith.constant dense<0.000000e+00> : vector<16x512xf32>
    %3 = tpu.matmul %1, %2, %cst {dimension_numbers = #tpu.dot_dimension_numbers<[1], [0], [0], [1], [0, 0, 1, 1], [], []>} : vector<16x784xbf16>, vector<784x512xbf16>, vector<16x512xf32> -> vector<16x512xf32>
    %c0_3 = arith.constant 0 : index
    %c0_4 = arith.constant 0 : index
    %4 = vector.load %arg3[%c0_3, %c0_4] : memref<1x512xf32, #tpu.memory_space<vmem>>, vector<1x512xf32>
    %5 = vector.broadcast %4 : vector<1x512xf32> to vector<16x512xf32>
    %6 = arith.addf %3, %5 : vector<16x512xf32>
    %cst_5 = arith.constant 0.000000e+00 : f32
    %7 = vector.broadcast %cst_5 : f32 to vector<16x512xf32>
    %8 = arith.maximumf %6, %7 : vector<16x512xf32>
    %9 = arith.truncf %8 : vector<16x512xf32> to vector<16x512xbf16>
    %c0_6 = arith.constant 0 : index
    %c0_7 = arith.constant 0 : index
    %10 = vector.load %arg4[%c0_6, %c0_7] : memref<512x512xbf16, #tpu.memory_space<vmem>>, vector<512x512xbf16>
    %cst_8 = arith.constant dense<0.000000e+00> : vector<16x512xf32>
    %11 = tpu.matmul %9, %10, %cst_8 {dimension_numbers = #tpu.dot_dimension_numbers<[1], [0], [0], [1], [0, 0, 1, 1], [], []>} : vector<16x512xbf16>, vector<512x512xbf16>, vector<16x512xf32> -> vector<16x512xf32>
    %c0_9 = arith.constant 0 : index
    %c0_10 = arith.constant 0 : index
    %12 = vector.load %arg5[%c0_9, %c0_10] : memref<1x512xf32, #tpu.memory_space<vmem>>, vector<1x512xf32>
    %13 = vector.broadcast %12 : vector<1x512xf32> to vector<16x512xf32>
    %14 = arith.addf %11, %13 : vector<16x512xf32>
    %cst_11 = arith.constant 0.000000e+00 : f32
    %15 = vector.broadcast %cst_11 : f32 to vector<16x512xf32>
    %16 = arith.maximumf %14, %15 : vector<16x512xf32>
    %17 = arith.truncf %16 : vector<16x512xf32> to vector<16x512xbf16>
    %c0_12 = arith.constant 0 : index
    %c0_13 = arith.constant 0 : index
    %18 = vector.load %arg6[%c0_12, %c0_13] : memref<512x128xbf16, #tpu.memory_space<vmem>>, vector<512x128xbf16>
    %cst_14 = arith.constant dense<0.000000e+00> : vector<16x128xf32>
    %19 = tpu.matmul %17, %18, %cst_14 {dimension_numbers = #tpu.dot_dimension_numbers<[1], [0], [0], [1], [0, 0, 1, 1], [], []>} : vector<16x512xbf16>, vector<512x128xbf16>, vector<16x128xf32> -> vector<16x128xf32>
    %c0_15 = arith.constant 0 : index
    %c0_16 = arith.constant 0 : index
    %20 = vector.load %arg7[%c0_15, %c0_16] : memref<1x128xf32, #tpu.memory_space<vmem>>, vector<1x128xf32>
    %21 = vector.broadcast %20 : vector<1x128xf32> to vector<16x128xf32>
    %22 = arith.addf %19, %21 : vector<16x128xf32>
    %cst_17 = arith.constant dense<0xFF800000> : vector<16xf32>
    %23 = vector.multi_reduction <maximumf>, %22, %cst_17 [1] : vector<16x128xf32> to vector<16xf32>
    %24 = vector.shape_cast %23 : vector<16xf32> to vector<16x1xf32>
    %25 = vector.broadcast %24 : vector<16x1xf32> to vector<16x128xf32>
    %26 = arith.subf %22, %25 : vector<16x128xf32>
    %27 = math.exp %26 : vector<16x128xf32>
    %cst_18 = arith.constant dense<0.000000e+00> : vector<16xf32>
    %28 = vector.multi_reduction <add>, %27, %cst_18 [1] : vector<16x128xf32> to vector<16xf32>
    %29 = vector.shape_cast %28 : vector<16xf32> to vector<16x1xf32>
    %30 = tpu.reciprocal %29 {approx = true} : vector<16x1xf32> -> vector<16x1xf32>
    %31 = vector.broadcast %30 : vector<16x1xf32> to vector<16x128xf32>
    %32 = arith.mulf %27, %31 : vector<16x128xf32>
    %33 = arith.truncf %32 : vector<16x128xf32> to vector<16x128xbf16>
    %c0_19 = arith.constant 0 : index
    %c0_20 = arith.constant 0 : index
    %34 = vector.load %arg8[%c0_19, %c0_20] : memref<16x128xbf16, #tpu.memory_space<vmem>>, vector<16x128xbf16>
    tpu.vector_store %arg8[%c0_19, %c0_20], %33 {strides = array<i32>} : memref<16x128xbf16, #tpu.memory_space<vmem>>, vector<16x128xbf16>,
    return
  }
  func.func @transform_0(%arg0: i32) -> (i32, i32) {
    %c0_i32 = arith.constant 0 : i32
    %c0_i32_0 = arith.constant 0 : i32
    return %arg0, %c0_i32 : i32, i32
  }
  func.func @transform_1(%arg0: i32) -> (i32, i32) {
    %c0_i32 = arith.constant 0 : i32
    %c0_i32_0 = arith.constant 0 : i32
    %c0_i32_1 = arith.constant 0 : i32
    return %c0_i32, %c0_i32_0 : i32, i32
  }
  func.func @transform_2(%arg0: i32) -> (i32, i32) {
    %c0_i32 = arith.constant 0 : i32
    %c0_i32_0 = arith.constant 0 : i32
    %c0_i32_1 = arith.constant 0 : i32
    return %c0_i32, %c0_i32_0 : i32, i32
  }
  func.func @transform_3(%arg0: i32) -> (i32, i32) {
    %c0_i32 = arith.constant 0 : i32
    %c0_i32_0 = arith.constant 0 : i32
    %c0_i32_1 = arith.constant 0 : i32
    return %c0_i32, %c0_i32_0 : i32, i32
  }
  func.func @transform_4(%arg0: i32) -> (i32, i32) {
    %c0_i32 = arith.constant 0 : i32
    %c0_i32_0 = arith.constant 0 : i32
    %c0_i32_1 = arith.constant 0 : i32
    return %c0_i32, %c0_i32_0 : i32, i32
  }
  func.func @transform_5(%arg0: i32) -> (i32, i32) {
    %c0_i32 = arith.constant 0 : i32
    %c0_i32_0 = arith.constant 0 : i32
    %c0_i32_1 = arith.constant 0 : i32
    return %c0_i32, %c0_i32_0 : i32, i32
  }
  func.func @transform_6(%arg0: i32) -> (i32, i32) {
    %c0_i32 = arith.constant 0 : i32
    %c0_i32_0 = arith.constant 0 : i32
    %c0_i32_1 = arith.constant 0 : i32
    return %c0_i32, %c0_i32_0 : i32, i32
  }
  func.func @transform_7(%arg0: i32) -> (i32, i32) {
    %c0_i32 = arith.constant 0 : i32
    %c0_i32_0 = arith.constant 0 : i32
    return %arg0, %c0_i32 : i32, i32
  }
}

</mosaic_0001>

<bundles_post_ra>
// kernel: tpu_custom_call.1
= control target key start
LH: loop header
LB: loop body
LE: loop exit
PB: predicated region body
PF: predicated region fallthrough
CT: control target
= control target key end

     0   :  { %12 = vsyncpa [#allocation3], 0  ;;  %s4312_s0 = inlined_call_operand.hbm [shape: f32[16,784], index: 0, kind: input, shape index: {}]   ;;  %s4313_s1 = inlined_call_operand.hbm [shape: bf16[784,512], index: 1, kind: input, shape index: {}]   ;;  %s4314_s2 = inlined_call_operand.vmem [shape: f32[1,512], index: 2, kind: input, shape index: {}]   ;;  %s4315_s3 = inlined_call_operand.hbm [shape: bf16[512,512], index: 3, kind: input, shape index: {}]   ;;  %s4316_s4 = inlined_call_operand.vmem [shape: f32[1,512], index: 4, kind: input, shape index: {}]   ;;  %s4317_s5 = inlined_call_operand.hbm [shape: bf16[512,128], index: 5, kind: input, shape index: {}]   ;;  %s4318_s6 = inlined_call_operand.vmem [shape: f32[1,128], index: 6, kind: input, shape index: {}]   ;;  %s4319_s7 = inlined_call_operand.hbm [shape: bf16[16,128], index: 7, kind: output, shape index: {}]  }
   0x1   :  { %13 = vsyncpa [#allocation6], 0 }
   0x2   :  { %14 = vsyncpa [#allocation9], 0 }
   0x3   :  { %15 = vsyncpa [#allocation4], 0  ;;  %s4144_s24 = smov [#allocation5]   ;;  %s4026_s28 = scalar_lea.hbm %s4313_s1, 25088 }
   0x4   :  { %s33_s25 = sshll.u32 %s4144_s24, 4  ;;  %p4027_p0 = scmp.ne.s32.totalorder %s4313_s1, %s4026_s28  ;;  %s34_s25 = int_to_ptr.vmem [resolvable:$true] %s33_s25 }
   0x5   :  { %p4030_p1 = scmp.lt.u32.totalorder %s4026_s28, %s4313_s1 }
   0x7   :  { %p4032_p2 = pnand %p4030_p1, %p4027_p0 }
   0x9   :  { %4035 = shalt.err (!%p4032_p2)
}
   0xa   :  { %s4036_s10 = scalar_lea.vmem %s34_s25, 25088  ;;  %p4041_p4 = scmp.lt.s32.totalorder %s34_s25, %s34_s25 }
   0xb   :  { %p4037_p3 = scmp.ne.s32.totalorder %s34_s25, %s4036_s10  ;;  %p4042_p5 = scmp.lt.s32.totalorder %s4036_s10, %s4036_s10 }
   0xd   :  { %p4043_p6 = por %p4042_p5, %p4041_p4 }
   0xf   :  { %p4044_p7 = pnand %p4043_p6, %p4037_p3 }
  0x11   :  { %4047 = shalt.err (!%p4044_p7)
}
  0x12   :  { %s4145_s11 = smov 256   ;;  %s4146_s12 = smov 16  }
  0x13   :  { %39 = dma.hbm_to_vmem [thread:$0]  %s4313_s1, 25088, %s34_s25, [#allocation6], %s4145_s11, %s4145_s11, %s4146_s12  }
  0x14   :  { %s4147_s15 = smov [#allocation2]   ;;  %s4048_s19 = scalar_lea.hbm %s4312_s0, 1792 }
  0x15   :  { %s21_s16 = sshll.u32 %s4147_s15, 4  ;;  %p4049_p8 = scmp.ne.s32.totalorder %s4312_s0, %s4048_s19  ;;  %s22_s16 = int_to_ptr.vmem [resolvable:$true] %s21_s16 }
  0x16   :  { %p4052_p9 = scmp.lt.u32.totalorder %s4048_s19, %s4312_s0 }
  0x18   :  { %p4054_p10 = pnand %p4052_p9, %p4049_p8 }
  0x1a   :  { %4057 = shalt.err (!%p4054_p10)
}
  0x1b   :  { %s4058_s24 = scalar_lea.vmem %s22_s16, 1792  ;;  %p4063_p12 = scmp.lt.s32.totalorder %s22_s16, %s22_s16 }
  0x1c   :  { %p4059_p11 = scmp.ne.s32.totalorder %s22_s16, %s4058_s24  ;;  %p4064_p13 = scmp.lt.s32.totalorder %s4058_s24, %s4058_s24 }
  0x1e   :  { %p4065_p0 = por %p4064_p13, %p4063_p12 }
  0x20   :  { %p4066_p1 = pnand %p4065_p0, %p4059_p11 }
  0x22   :  { %4069 = shalt.err (!%p4066_p1)
}
  0x23   :  { %s4148_s1 = smov 896   ;;  %s4149_s25 = smov 56  }
  0x24   :  { %27 = dma.hbm_to_vmem [thread:$0]  %s4312_s0, 1792, %s22_s16, [#allocation3], %s4148_s1, %s4148_s1, %s4149_s25  }
  0x25   :  { %s4150_s28 = smov [#allocation7]   ;;  %s4151_s30 = smov [#allocation8]  }
  0x26   :  { %s47_s29 = sshll.u32 %s4150_s28, 4  ;;  %s61_s8 = sshll.u32 %s4151_s30, 4  ;;  %s48_s29 = int_to_ptr.vmem [resolvable:$true] %s47_s29  ;;  %s4223_s8 = int_to_ptr.vmem [resolvable:$true] %s61_s8 }
  0x27   :  { %s4070_s13 = scalar_lea.hbm %s4315_s3, 16384 }
  0x28   :  { %p4071_p2 = scmp.ne.s32.totalorder %s4315_s3, %s4070_s13  ;;  %p4074_p3 = scmp.lt.u32.totalorder %s4070_s13, %s4315_s3 }
  0x2a   :  { %p4076_p4 = pnand %p4074_p3, %p4071_p2 }
  0x2c   :  { %4079 = shalt.err (!%p4076_p4)
}
  0x2d   :  { %s4080_s0 = scalar_lea.vmem %s48_s29, 16384  ;;  %p4085_p6 = scmp.lt.s32.totalorder %s48_s29, %s48_s29 }
  0x2e   :  { %p4081_p5 = scmp.ne.s32.totalorder %s48_s29, %s4080_s0  ;;  %p4086_p7 = scmp.lt.s32.totalorder %s4080_s0, %s4080_s0 }
  0x30   :  { %p4087_p8 = por %p4086_p7, %p4085_p6 }
  0x32   :  { %p4088_p9 = pnand %p4087_p8, %p4081_p5 }
  0x34   :  { %4091 = shalt.err (!%p4088_p9)
}
  0x35   :  { %53 = dma.hbm_to_vmem [thread:$0]  %s4315_s3, 16384, %s48_s29, [#allocation6], %s4145_s11, %s4145_s11, %s4146_s12  }
  0x36   :  { %s4092_s22 = scalar_lea.hbm %s4317_s5, 4096 }
  0x37   :  { %p4093_p10 = scmp.ne.s32.totalorder %s4317_s5, %s4092_s22  ;;  %p4096_p11 = scmp.lt.u32.totalorder %s4092_s22, %s4317_s5 }
  0x39   :  { %p4098_p12 = pnand %p4096_p11, %p4093_p10 }
  0x3b   :  { %4101 = shalt.err (!%p4098_p12)
}
  0x3c   :  { %s4102_s26 = scalar_lea.vmem %s4223_s8, 4096  ;;  %p4107_p0 = scmp.lt.s32.totalorder %s4223_s8, %s4223_s8 }
  0x3d   :  { %p4103_p13 = scmp.ne.s32.totalorder %s4223_s8, %s4102_s26  ;;  %p4108_p1 = scmp.lt.s32.totalorder %s4102_s26, %s4102_s26 }
  0x3f   :  { %p4109_p2 = por %p4108_p1, %p4107_p0 }
  0x41   :  { %p4110_p3 = pnand %p4109_p2, %p4103_p13 }
  0x43   :  { %4113 = shalt.err (!%p4110_p3)
}
  0x44   :  { %s4152_s3 = smov 64   ;;  %s4153_s11 = smov 4  }
  0x45   :  { %67 = dma.hbm_to_vmem [thread:$0]  %s4317_s5, 4096, %s4223_s8, [#allocation9], %s4152_s3, %s4152_s3, %s4153_s11  }
  0x46   :  { %4136 = dma.done.wait [#allocation3], 1792  }
  0x47   :  { %4137 = vsyncadd [#allocation3], 4294965504 }
  0x48   :  { %4138 = dma.done.wait [#allocation6], 41472  }
  0x49   :  { %4139 = vsyncadd [#allocation6], 4294925824 }
  0x4a   :  { %4140 = dma.done.wait [#allocation9], 4096  }
  0x4b   :  { %4141 = vsyncadd [#allocation9], 4294963200  ;;  %v3500_v0 = vld [vmem:[#allocation5 + $0x4] ss:$16 sps:$4 sm:$0xff]   ;;  %v3502_v1 = vld [vmem:[#allocation5 + $0xc] ss:$16 sps:$4 sm:$0xff]  }
  0x4c   :  { %1306 = vmatprep.subr.bf16.mxu0 %v3500_v0  ;;  %v3504_v2 = vld [vmem:[#allocation5] ss:$16 sps:$4 sm:$0xff]   ;;  %v3505_v3 = vld [vmem:[#allocation5 + $0x8] ss:$16 sps:$4 sm:$0xff]   ;;  %1478 = vmatprep.subr.bf16.mxu1 %v3502_v1  ;;  %v3506_v4 = vld [vmem:[#allocation5 + $0x24] ss:$16 sps:$4 sm:$0xff]  }
  0x4d   :  { %1307 = vmatpush1.bf16.msra.mxu0 %v3504_v2  ;;  %1479 = vmatpush1.bf16.msra.mxu1 %v3505_v3  ;;  %v3508_v5 = vld [vmem:[#allocation5 + $0x2c] ss:$16 sps:$4 sm:$0xff]   ;;  %v3510_v6 = vld [vmem:[#allocation5 + $0x20] ss:$16 sps:$4 sm:$0xff]   ;;  %v3511_v7 = vld [vmem:[#allocation5 + $0x28] ss:$16 sps:$4 sm:$0xff]  }
  0x4e   :  { %1308 = vmatprep.subr.bf16.mxu0 %v3506_v4  ;;  %1480 = vmatprep.subr.bf16.mxu1 %v3508_v5  ;;  %v3512_v8 = vld [vmem:[#allocation5 + $0x44] ss:$16 sps:$4 sm:$0xff]   ;;  %v3514_v9 = vld [vmem:[#allocation5 + $0x4c] ss:$16 sps:$4 sm:$0xff]   ;;  %v3516_v10 = vld [vmem:[#allocation5 + $0x40] ss:$16 sps:$4 sm:$0xff]  }
  0x4f   :  { %v3517_v11 = vld [vmem:[#allocation5 + $0x48] ss:$16 sps:$4 sm:$0xff]   ;;  %v3518_v12 = vld [vmem:[#allocation5 + $0x64] ss:$16 sps:$4 sm:$0xff]   ;;  %v3520_v13 = vld [vmem:[#allocation5 + $0x6c] ss:$16 sps:$4 sm:$0xff]  }
  0x50   :  { %v3522_v14 = vld [vmem:[#allocation5 + $0x60] ss:$16 sps:$4 sm:$0xff]   ;;  %v3523_v15 = vld [vmem:[#allocation5 + $0x68] ss:$16 sps:$4 sm:$0xff]   ;;  %v3524_v16 = vld [vmem:[#allocation5 + $0x84] ss:$16 sps:$4 sm:$0xff]  }
  0x51   :  { %1309 = vmatpush1.bf16.msra.mxu0 %v3510_v6  ;;  %1481 = vmatpush1.bf16.msra.mxu1 %v3511_v7  ;;  %v3526_v17 = vld [vmem:[#allocation5 + $0x8c] ss:$16 sps:$4 sm:$0xff]   ;;  %v3528_v18 = vld [vmem:[#allocation5 + $0x80] ss:$16 sps:$4 sm:$0xff]   ;;  %v3529_v19 = vld [vmem:[#allocation5 + $0x88] ss:$16 sps:$4 sm:$0xff]  }
  0x52   :  { %1310 = vmatprep.subr.bf16.mxu0 %v3512_v8  ;;  %1482 = vmatprep.subr.bf16.mxu1 %v3514_v9  ;;  %v3530_v20 = vld [vmem:[#allocation5 + $0xa4] ss:$16 sps:$4 sm:$0xff]   ;;  %v3532_v21 = vld [vmem:[#allocation5 + $0xac] ss:$16 sps:$4 sm:$0xff]   ;;  %v3534_v22 = vld [vmem:[#allocation5 + $0xa0] ss:$16 sps:$4 sm:$0xff]  }
  0x53   :  { %v3535_v23 = vld [vmem:[#allocation5 + $0xa8] ss:$16 sps:$4 sm:$0xff]   ;;  %v3536_v24 = vld [vmem:[#allocation5 + $0xc4] ss:$16 sps:$4 sm:$0xff]   ;;  %v3538_v25 = vld [vmem:[#allocation5 + $0xcc] ss:$16 sps:$4 sm:$0xff]  }
  0x54   :  { %v3540_v26 = vld [vmem:[#allocation5 + $0xc0] ss:$16 sps:$4 sm:$0xff]   ;;  %v3541_v27 = vld [vmem:[#allocation5 + $0xc8] ss:$16 sps:$4 sm:$0xff]   ;;  %v3542_v28 = vld [vmem:[#allocation5 + $0xe4] ss:$16 sps:$4 sm:$0xff]  }
  0x55   :  { %1311 = vmatpush1.bf16.msra.mxu0 %v3516_v10  ;;  %1483 = vmatpush1.bf16.msra.mxu1 %v3517_v11  ;;  %v3544_v29 = vld [vmem:[#allocation5 + $0xec] ss:$16 sps:$4 sm:$0xff]   ;;  %v3546_v30 = vld [vmem:[#allocation5 + $0xe0] ss:$16 sps:$4 sm:$0xff]   ;;  %v3547_v31 = vld [vmem:[#allocation5 + $0xe8] ss:$16 sps:$4 sm:$0xff]  }
  0x56   :  { %1312 = vmatprep.subr.bf16.mxu0 %v3518_v12  ;;  %1484 = vmatprep.subr.bf16.mxu1 %v3520_v13  ;;  %v3548_v32 = vld [vmem:[#allocation5 + $0x104] ss:$16 sps:$4 sm:$0xff]   ;;  %v3550_v33 = vld [vmem:[#allocation5 + $0x10c] ss:$16 sps:$4 sm:$0xff]   ;;  %v3552_v34 = vld [vmem:[#allocation5 + $0x100] ss:$16 sps:$4 sm:$0xff]  }
  0x57   :  { %v3553_v35 = vld [vmem:[#allocation5 + $0x108] ss:$16 sps:$4 sm:$0xff]   ;;  %v3554_v36 = vld [vmem:[#allocation5 + $0x124] ss:$16 sps:$4 sm:$0xff]   ;;  %v3556_v37 = vld [vmem:[#allocation5 + $0x12c] ss:$16 sps:$4 sm:$0xff]  }
  0x58   :  { %v3558_v38 = vld [vmem:[#allocation5 + $0x120] ss:$16 sps:$4 sm:$0xff]   ;;  %v3559_v39 = vld [vmem:[#allocation5 + $0x128] ss:$16 sps:$4 sm:$0xff]   ;;  %v3560_v40 = vld [vmem:[#allocation5 + $0x144] ss:$16 sps:$4 sm:$0xff]  }
  0x59   :  { %1313 = vmatpush1.bf16.msra.mxu0 %v3522_v14  ;;  %1485 = vmatpush1.bf16.msra.mxu1 %v3523_v15  ;;  %v3562_v41 = vld [vmem:[#allocation5 + $0x14c] ss:$16 sps:$4 sm:$0xff]   ;;  %v3564_v42 = vld [vmem:[#allocation5 + $0x140] ss:$16 sps:$4 sm:$0xff]   ;;  %v3565_v43 = vld [vmem:[#allocation5 + $0x148] ss:$16 sps:$4 sm:$0xff]  }
  0x5a   :  { %1314 = vmatprep.subr.bf16.mxu0 %v3524_v16  ;;  %1486 = vmatprep.subr.bf16.mxu1 %v3526_v17  ;;  %v3566_v44 = vld [vmem:[#allocation5 + $0x164] ss:$16 sps:$4 sm:$0xff]   ;;  %v3568_v45 = vld [vmem:[#allocation5 + $0x16c] ss:$16 sps:$4 sm:$0xff]   ;;  %v3570_v48 = vld [vmem:[#allocation5 + $0x160] ss:$16 sps:$4 sm:$0xff]  }
  0x5b   :  { %v84_v46 = vld [vmem:[#allocation2 + $0x8] sm:$0xff]  ;;  %v91_v47 = vld [vmem:[#allocation2 + $0x40] sm:$0xff]  ;;  %v90_v5 = vld [vmem:[#allocation2 + $0x38] sm:$0xff]  ;;  %vm1302_vm0 = vcmask 130048  }
  0x5c   :  { %v3571_v49 = vld [vmem:[#allocation5 + $0x168] ss:$16 sps:$4 sm:$0xff]   ;;  %v98_v50 = vpack.c.bf16 %v91_v47, %v84_v46  ;;  %v3572_v51 = vld [vmem:[#allocation5 + $0x184] ss:$16 sps:$4 sm:$0xff]   ;;  %v3574_v52 = vld [vmem:[#allocation5 + $0x18c] ss:$16 sps:$4 sm:$0xff]  }
  0x5d   :  { %1315 = vmatpush1.bf16.msra.mxu0 %v3528_v18  ;;  %1487 = vmatpush1.bf16.msra.mxu1 %v3529_v19  ;;  %v3576_v53 = vld [vmem:[#allocation5 + $0x180] ss:$16 sps:$4 sm:$0xff]   ;;  %v3577_v54 = vld [vmem:[#allocation5 + $0x188] ss:$16 sps:$4 sm:$0xff]   ;;  %v3578_v55 = vld [vmem:[#allocation5 + $0x1a4] ss:$16 sps:$4 sm:$0xff]  }
  0x5e   :  { %1316 = vmatprep.subr.bf16.mxu0 %v3530_v20  ;;  %1488 = vmatprep.subr.bf16.mxu1 %v3532_v21  ;;  %v3580_v56 = vld [vmem:[#allocation5 + $0x1ac] ss:$16 sps:$4 sm:$0xff]   ;;  %v3582_v57 = vld [vmem:[#allocation5 + $0x1a0] ss:$16 sps:$4 sm:$0xff]   ;;  %v3583_v58 = vld [vmem:[#allocation5 + $0x1a8] ss:$16 sps:$4 sm:$0xff]  }
  0x5f   :  { %1338 = vmatprep.mubr.bf16.mxu0 %v98_v50  ;;  %1510 = vmatprep.mubr.bf16.mxu1 %v98_v50  ;;  %v3584_v59 = vld [vmem:[#allocation5 + $0x1c4] ss:$16 sps:$4 sm:$0xff]   ;;  %v3586_v60 = vld [vmem:[#allocation5 + $0x1cc] ss:$16 sps:$4 sm:$0xff]   ;;  %v3588_v61 = vld [vmem:[#allocation5 + $0x1c0] ss:$16 sps:$4 sm:$0xff]  }
  0x60   :  { %v3589_v62 = vld [vmem:[#allocation5 + $0x1c8] ss:$16 sps:$4 sm:$0xff]   ;;  %v3590_v63 = vld [vmem:[#allocation5 + $0x1e4] ss:$16 sps:$4 sm:$0xff]   ;;  %v3592_v0 = vld [vmem:[#allocation5 + $0x1ec] ss:$16 sps:$4 sm:$0xff]  }
  0x61   :  { %1317 = vmatpush1.bf16.msra.mxu0 %v3534_v22  ;;  %1489 = vmatpush1.bf16.msra.mxu1 %v3535_v23  ;;  %v3594_v1 = vld [vmem:[#allocation5 + $0x1e0] ss:$16 sps:$4 sm:$0xff]   ;;  %v3595_v2 = vld [vmem:[#allocation5 + $0x1e8] ss:$16 sps:$4 sm:$0xff]   ;;  %v3598_v3 = vld [vmem:[#allocation5 + $0x204] ss:$16 sps:$4 sm:$0xff]  }
  0x62   :  { %1318 = vmatprep.subr.bf16.mxu0 %v3536_v24  ;;  %1490 = vmatprep.subr.bf16.mxu1 %v3538_v25  ;;  %v83_v4 = vld [vmem:[#allocation2] sm:$0xff]  ;;  %v3601_v6 = vld [vmem:[#allocation5 + $0x20c] ss:$16 sps:$4 sm:$0xff]   ;;  %v3599_v8 = vld [vmem:[#allocation5 + $0x208] ss:$16 sps:$4 sm:$0xff]  }
  0x63   :  { %v3596_v7 = vld [vmem:[#allocation5 + $0x200] ss:$16 sps:$4 sm:$0xff]   ;;  %v97_v9 = vpack.c.bf16 %v90_v5, %v83_v4  ;;  %v3604_v10 = vld [vmem:[#allocation5 + $0x224] ss:$16 sps:$4 sm:$0xff]   ;;  %v3607_v11 = vld [vmem:[#allocation5 + $0x22c] ss:$16 sps:$4 sm:$0xff]  }
  0x64   :  { %v3602_v12 = vld [vmem:[#allocation5 + $0x220] ss:$16 sps:$4 sm:$0xff]   ;;  %v3605_v13 = vld [vmem:[#allocation5 + $0x228] ss:$16 sps:$4 sm:$0xff]   ;;  %v3610_v14 = vld [vmem:[#allocation5 + $0x244] ss:$16 sps:$4 sm:$0xff]  }
  0x65   :  { %1319 = vmatpush1.bf16.msra.mxu0 %v3540_v26  ;;  %1491 = vmatpush1.bf16.msra.mxu1 %v3541_v27  ;;  %v3613_v15 = vld [vmem:[#allocation5 + $0x24c] ss:$16 sps:$4 sm:$0xff]   ;;  %v3608_v16 = vld [vmem:[#allocation5 + $0x240] ss:$16 sps:$4 sm:$0xff]   ;;  %v3611_v17 = vld [vmem:[#allocation5 + $0x248] ss:$16 sps:$4 sm:$0xff]  }
  0x66   :  { %1320 = vmatprep.subr.bf16.mxu0 %v3542_v28  ;;  %1492 = vmatprep.subr.bf16.mxu1 %v3544_v29  ;;  %v3616_v18 = vld [vmem:[#allocation5 + $0x264] ss:$16 sps:$4 sm:$0xff]   ;;  %v3619_v19 = vld [vmem:[#allocation5 + $0x26c] ss:$16 sps:$4 sm:$0xff]   ;;  %v3614_v20 = vld [vmem:[#allocation5 + $0x260] ss:$16 sps:$4 sm:$0xff]  }
  0x67   :  { %v3617_v21 = vld [vmem:[#allocation5 + $0x268] ss:$16 sps:$4 sm:$0xff]   ;;  %v3622_v22 = vld [vmem:[#allocation5 + $0x284] ss:$16 sps:$4 sm:$0xff]   ;;  %v3625_v23 = vld [vmem:[#allocation5 + $0x28c] ss:$16 sps:$4 sm:$0xff]  }
  0x68   :  { %v3620_v24 = vld [vmem:[#allocation5 + $0x280] ss:$16 sps:$4 sm:$0xff]   ;;  %v3623_v25 = vld [vmem:[#allocation5 + $0x288] ss:$16 sps:$4 sm:$0xff]   ;;  %v3628_v26 = vld [vmem:[#allocation5 + $0x2a4] ss:$16 sps:$4 sm:$0xff]  }
  0x69   :  { %1321 = vmatpush1.bf16.msra.mxu0 %v3546_v30  ;;  %1493 = vmatpush1.bf16.msra.mxu1 %v3547_v31  ;;  %v3631_v27 = vld [vmem:[#allocation5 + $0x2ac] ss:$16 sps:$4 sm:$0xff]   ;;  %v3626_v28 = vld [vmem:[#allocation5 + $0x2a0] ss:$16 sps:$4 sm:$0xff]   ;;  %v3629_v29 = vld [vmem:[#allocation5 + $0x2a8] ss:$16 sps:$4 sm:$0xff]  }
  0x6a   :  { %1322 = vmatprep.subr.bf16.mxu0 %v3548_v32  ;;  %1494 = vmatprep.subr.bf16.mxu1 %v3550_v33  ;;  %v3634_v30 = vld [vmem:[#allocation5 + $0x2c4] ss:$16 sps:$4 sm:$0xff]   ;;  %v3637_v31 = vld [vmem:[#allocation5 + $0x2cc] ss:$16 sps:$4 sm:$0xff]   ;;  %v3650_v47 = vld [vmem:[#allocation5 + $0x320] ss:$16 sps:$4 sm:$0xff]  }
  0x6b   :  { %v86_v32 = vld [vmem:[#allocation2 + $0x18] sm:$0xff]  ;;  %v93_v33 = vld [vmem:[#allocation2 + $0x50] sm:$0xff] }
  0x6c   :  { %v3655_v46 = vld [vmem:[#allocation5 + $0x32c] ss:$16 sps:$4 sm:$0xff]   ;;  %v3683_v4 = vld [vmem:[#allocation5 + $0x3c8] ss:$16 sps:$4 sm:$0xff]   ;;  %v3688_v5 = vld [vmem:[#allocation5 + $0x3e4] ss:$16 sps:$4 sm:$0xff]  }
  0x6d   :  { %1323 = vmatpush1.bf16.msra.mxu0 %v3552_v34  ;;  %1495 = vmatpush1.bf16.msra.mxu1 %v3553_v35  ;;  %v3632_v34 = vld [vmem:[#allocation5 + $0x2c0] ss:$16 sps:$4 sm:$0xff]   ;;  %v3635_v35 = vld [vmem:[#allocation5 + $0x2c8] ss:$16 sps:$4 sm:$0xff]   ;;  %v3661_v50 = vld [vmem:[#allocation5 + $0x34c] ss:$16 sps:$4 sm:$0xff]  }
  0x6e   :  { %1324 = vmatprep.subr.bf16.mxu0 %v3554_v36  ;;  %1496 = vmatprep.subr.bf16.mxu1 %v3556_v37  ;;  %v100_v36 = vpack.c.bf16 %v93_v33, %v86_v32  ;;  %v3640_v37 = vld [vmem:[#allocation5 + $0x2e4] ss:$16 sps:$4 sm:$0xff]   ;;  %v3721_v32 = vld [vmem:[#allocation5 + $0x48c] ss:$16 sps:$4 sm:$0xff]   ;;  %v3716_v33 = vld [vmem:[#allocation5 + $0x480] ss:$16 sps:$4 sm:$0xff]  }
  0x71   :  { %1325 = vmatpush1.bf16.msra.mxu0 %v3558_v38  ;;  %1497 = vmatpush1.bf16.msra.mxu1 %v3559_v39  ;;  %v3643_v38 = vld [vmem:[#allocation5 + $0x2ec] ss:$16 sps:$4 sm:$0xff]   ;;  %v3638_v39 = vld [vmem:[#allocation5 + $0x2e0] ss:$16 sps:$4 sm:$0xff]  }
  0x72   :  { %1326 = vmatprep.subr.bf16.mxu0 %v3560_v40  ;;  %1498 = vmatprep.subr.bf16.mxu1 %v3562_v41  ;;  %v3641_v40 = vld [vmem:[#allocation5 + $0x2e8] ss:$16 sps:$4 sm:$0xff]   ;;  %v3646_v41 = vld [vmem:[#allocation5 + $0x304] ss:$16 sps:$4 sm:$0xff]  }
  0x75   :  { %1327 = vmatpush1.bf16.msra.mxu0 %v3564_v42  ;;  %1499 = vmatpush1.bf16.msra.mxu1 %v3565_v43  ;;  %v3649_v42 = vld [vmem:[#allocation5 + $0x30c] ss:$16 sps:$4 sm:$0xff]   ;;  %v3644_v43 = vld [vmem:[#allocation5 + $0x300] ss:$16 sps:$4 sm:$0xff]  }
  0x76   :  { %1328 = vmatprep.subr.bf16.mxu0 %v3566_v44  ;;  %1500 = vmatprep.subr.bf16.mxu1 %v3568_v45  ;;  %v3647_v44 = vld [vmem:[#allocation5 + $0x308] ss:$16 sps:$4 sm:$0xff]   ;;  %v3652_v45 = vld [vmem:[#allocation5 + $0x324] ss:$16 sps:$4 sm:$0xff]  }
  0x79   :  { %1329 = vmatpush1.bf16.msra.mxu0 %v3570_v48  ;;  %1501 = vmatpush1.bf16.msra.mxu1 %v3571_v49  ;;  %v3653_v48 = vld [vmem:[#allocation5 + $0x328] ss:$16 sps:$4 sm:$0xff]   ;;  %v3658_v49 = vld [vmem:[#allocation5 + $0x344] ss:$16 sps:$4 sm:$0xff]  }
  0x7a   :  { %1330 = vmatprep.subr.bf16.mxu0 %v3572_v51  ;;  %1502 = vmatprep.subr.bf16.mxu1 %v3574_v52  ;;  %v3656_v51 = vld [vmem:[#allocation5 + $0x340] ss:$16 sps:$4 sm:$0xff]   ;;  %v3659_v52 = vld [vmem:[#allocation5 + $0x348] ss:$16 sps:$4 sm:$0xff]  }
  0x7d   :  { %1331 = vmatpush1.bf16.msra.mxu0 %v3576_v53  ;;  %1503 = vmatpush1.bf16.msra.mxu1 %v3577_v54  ;;  %v3664_v53 = vld [vmem:[#allocation5 + $0x364] ss:$16 sps:$4 sm:$0xff]   ;;  %v3667_v54 = vld [vmem:[#allocation5 + $0x36c] ss:$16 sps:$4 sm:$0xff]  }
  0x7e   :  { %1332 = vmatprep.subr.bf16.mxu0 %v3578_v55  ;;  %1504 = vmatprep.subr.bf16.mxu1 %v3580_v56  ;;  %v3662_v55 = vld [vmem:[#allocation5 + $0x360] ss:$16 sps:$4 sm:$0xff]   ;;  %v3665_v56 = vld [vmem:[#allocation5 + $0x368] ss:$16 sps:$4 sm:$0xff]  }
  0x81   :  { %1333 = vmatpush1.bf16.msra.mxu0 %v3582_v57  ;;  %1505 = vmatpush1.bf16.msra.mxu1 %v3583_v58  ;;  %v3670_v57 = vld [vmem:[#allocation5 + $0x384] ss:$16 sps:$4 sm:$0xff]   ;;  %v3673_v58 = vld [vmem:[#allocation5 + $0x38c] ss:$16 sps:$4 sm:$0xff]  }
  0x82   :  { %1334 = vmatprep.subr.bf16.mxu0 %v3584_v59  ;;  %1506 = vmatprep.subr.bf16.mxu1 %v3586_v60  ;;  %v3668_v59 = vld [vmem:[#allocation5 + $0x380] ss:$16 sps:$4 sm:$0xff]   ;;  %v3671_v60 = vld [vmem:[#allocation5 + $0x388] ss:$16 sps:$4 sm:$0xff]  }
  0x85   :  { %1335 = vmatpush1.bf16.msra.mxu0 %v3588_v61  ;;  %1507 = vmatpush1.bf16.msra.mxu1 %v3589_v62  ;;  %v3676_v61 = vld [vmem:[#allocation5 + $0x3a4] ss:$16 sps:$4 sm:$0xff]   ;;  %v3679_v62 = vld [vmem:[#allocation5 + $0x3ac] ss:$16 sps:$4 sm:$0xff]  }
  0x86   :  { %1336 = vmatprep.subr.bf16.mxu0 %v3590_v63  ;;  %1508 = vmatprep.subr.bf16.mxu1 %v3592_v0  ;;  %v3674_v63 = vld [vmem:[#allocation5 + $0x3a0] ss:$16 sps:$4 sm:$0xff]   ;;  %v3677_v0 = vld [vmem:[#allocation5 + $0x3a8] ss:$16 sps:$4 sm:$0xff]  }
  0x89   :  { %1337 = vmatpush1.bf16.msra.mxu0 %v3594_v1  ;;  %1509 = vmatpush1.bf16.msra.mxu1 %v3595_v2  ;;  %v3682_v1 = vld [vmem:[#allocation5 + $0x3c4] ss:$16 sps:$4 sm:$0xff]   ;;  %v3685_v2 = vld [vmem:[#allocation5 + $0x3cc] ss:$16 sps:$4 sm:$0xff]  }
  0x8a   :  { %1349 = vmatprep.subr.bf16.mxu0 %v3598_v3  ;;  %1521 = vmatprep.subr.bf16.mxu1 %v3601_v6  ;;  %v3680_v3 = vld [vmem:[#allocation5 + $0x3c0] ss:$16 sps:$4 sm:$0xff]   ;;  %v3691_v6 = vld [vmem:[#allocation5 + $0x3ec] ss:$16 sps:$4 sm:$0xff]  }
  0x8c   :  { %1339 = vmatmul.mubr.bf16.vlgmr.msra.gmra.mrb[0].mxu0 %v97_v9  ;;  %1511 = vmatmul.mubr.bf16.vlgmr.msra.gmra.mrb[0].mxu1 %v97_v9  ;;  %v3694_v9 = vld [vmem:[#allocation5 + $0x404] ss:$16 sps:$4 sm:$0xff]  }
  0x8d   :  { %1350 = vmatpush1.bf16.msra.mxu0 %v3596_v7  ;;  %1522 = vmatpush1.bf16.msra.mxu1 %v3599_v8  ;;  %v3686_v7 = vld [vmem:[#allocation5 + $0x3e0] ss:$16 sps:$4 sm:$0xff]   ;;  %v3689_v8 = vld [vmem:[#allocation5 + $0x3e8] ss:$16 sps:$4 sm:$0xff]  }
  0x8e   :  { %1351 = vmatprep.subr.bf16.mxu0 %v3604_v10  ;;  %1523 = vmatprep.subr.bf16.mxu1 %v3607_v11  ;;  %v85_v10 = vld [vmem:[#allocation2 + $0x10] sm:$0xff]  ;;  %v92_v11 = vld [vmem:[#allocation2 + $0x48] sm:$0xff] }
  0x8f   :  { %1381 = vmatprep.mubr.bf16.mxu0 %v100_v36  ;;  %1553 = vmatprep.mubr.bf16.mxu1 %v100_v36  ;;  %v3727_v36 = vld [vmem:[#allocation5 + $0x4ac] ss:$16 sps:$4 sm:$0xff]  }
  0x91   :  { %1352 = vmatpush1.bf16.msra.mxu0 %v3602_v12  ;;  %1524 = vmatpush1.bf16.msra.mxu1 %v3605_v13  ;;  %v3697_v12 = vld [vmem:[#allocation5 + $0x40c] ss:$16 sps:$4 sm:$0xff]   ;;  %v3692_v13 = vld [vmem:[#allocation5 + $0x400] ss:$16 sps:$4 sm:$0xff]  }
  0x92   :  { %1353 = vmatprep.subr.bf16.mxu0 %v3610_v14  ;;  %1525 = vmatprep.subr.bf16.mxu1 %v3613_v15  ;;  %v3695_v14 = vld [vmem:[#allocation5 + $0x408] ss:$16 sps:$4 sm:$0xff]   ;;  %v99_v15 = vpack.c.bf16 %v92_v11, %v85_v10  ;;  %v3784_v11 = vld [vmem:[#allocation5 + $0x5e4] ss:$16 sps:$4 sm:$0xff]  }
  0x93   :  { %v3779_v10 = vld [vmem:[#allocation5 + $0x5c8] ss:$16 sps:$4 sm:$0xff]  }
  0x95   :  { %1354 = vmatpush1.bf16.msra.mxu0 %v3608_v16  ;;  %1526 = vmatpush1.bf16.msra.mxu1 %v3611_v17  ;;  %v3700_v16 = vld [vmem:[#allocation5 + $0x424] ss:$16 sps:$4 sm:$0xff]   ;;  %v3703_v17 = vld [vmem:[#allocation5 + $0x42c] ss:$16 sps:$4 sm:$0xff]  }
  0x96   :  { %1355 = vmatprep.subr.bf16.mxu0 %v3616_v18  ;;  %1527 = vmatprep.subr.bf16.mxu1 %v3619_v19  ;;  %v88_v18 = vld [vmem:[#allocation2 + $0x28] sm:$0xff]  ;;  %v3698_v19 = vld [vmem:[#allocation5 + $0x420] ss:$16 sps:$4 sm:$0xff]  }
  0x99   :  { %1356 = vmatpush1.bf16.msra.mxu0 %v3614_v20  ;;  %1528 = vmatpush1.bf16.msra.mxu1 %v3617_v21  ;;  %v3701_v20 = vld [vmem:[#allocation5 + $0x428] ss:$16 sps:$4 sm:$0xff]   ;;  %v95_v21 = vld [vmem:[#allocation2 + $0x60] sm:$0xff] }
  0x9a   :  { %1357 = vmatprep.subr.bf16.mxu0 %v3622_v22  ;;  %1529 = vmatprep.subr.bf16.mxu1 %v3625_v23  ;;  %v3706_v22 = vld [vmem:[#allocation5 + $0x444] ss:$16 sps:$4 sm:$0xff]   ;;  %v102_v23 = vpack.c.bf16 %v95_v21, %v88_v18  ;;  %v3793_v18 = vld [vmem:[#allocation5 + $0x60c] ss:$16 sps:$4 sm:$0xff]  }
  0x9d   :  { %1358 = vmatpush1.bf16.msra.mxu0 %v3620_v24  ;;  %1530 = vmatpush1.bf16.msra.mxu1 %v3623_v25  ;;  %v3709_v24 = vld [vmem:[#allocation5 + $0x44c] ss:$16 sps:$4 sm:$0xff]   ;;  %v3704_v25 = vld [vmem:[#allocation5 + $0x440] ss:$16 sps:$4 sm:$0xff]  }
  0x9e   :  { %1359 = vmatprep.subr.bf16.mxu0 %v3628_v26  ;;  %1531 = vmatprep.subr.bf16.mxu1 %v3631_v27  ;;  %v3707_v26 = vld [vmem:[#allocation5 + $0x448] ss:$16 sps:$4 sm:$0xff]   ;;  %v3712_v27 = vld [vmem:[#allocation5 + $0x464] ss:$16 sps:$4 sm:$0xff]  }
  0xa1   :  { %1360 = vmatpush1.bf16.msra.mxu0 %v3626_v28  ;;  %1532 = vmatpush1.bf16.msra.mxu1 %v3629_v29  ;;  %v3715_v28 = vld [vmem:[#allocation5 + $0x46c] ss:$16 sps:$4 sm:$0xff]   ;;  %v3710_v29 = vld [vmem:[#allocation5 + $0x460] ss:$16 sps:$4 sm:$0xff]  }
  0xa2   :  { %1361 = vmatprep.subr.bf16.mxu0 %v3634_v30  ;;  %1533 = vmatprep.subr.bf16.mxu1 %v3637_v31  ;;  %v3713_v30 = vld [vmem:[#allocation5 + $0x468] ss:$16 sps:$4 sm:$0xff]   ;;  %v3718_v31 = vld [vmem:[#allocation5 + $0x484] ss:$16 sps:$4 sm:$0xff]  }
  0xa5   :  { %1362 = vmatpush1.bf16.msra.mxu0 %v3632_v34  ;;  %1534 = vmatpush1.bf16.msra.mxu1 %v3635_v35  ;;  %v3719_v34 = vld [vmem:[#allocation5 + $0x488] ss:$16 sps:$4 sm:$0xff]   ;;  %v3724_v35 = vld [vmem:[#allocation5 + $0x4a4] ss:$16 sps:$4 sm:$0xff]  }
  0xa6   :  { %1363 = vmatprep.subr.bf16.mxu0 %v3640_v37  ;;  %1535 = vmatprep.subr.bf16.mxu1 %v3643_v38  ;;  %v3722_v37 = vld [vmem:[#allocation5 + $0x4a0] ss:$16 sps:$4 sm:$0xff]   ;;  %v3725_v38 = vld [vmem:[#allocation5 + $0x4a8] ss:$16 sps:$4 sm:$0xff]  }
  0xa9   :  { %1364 = vmatpush1.bf16.msra.mxu0 %v3638_v39  ;;  %1536 = vmatpush1.bf16.msra.mxu1 %v3641_v40  ;;  %v3730_v39 = vld [vmem:[#allocation5 + $0x4c4] ss:$16 sps:$4 sm:$0xff]   ;;  %v3733_v40 = vld [vmem:[#allocation5 + $0x4cc] ss:$16 sps:$4 sm:$0xff]  }
  0xaa   :  { %1365 = vmatprep.subr.bf16.mxu0 %v3646_v41  ;;  %1537 = vmatprep.subr.bf16.mxu1 %v3649_v42  ;;  %v3728_v41 = vld [vmem:[#allocation5 + $0x4c0] ss:$16 sps:$4 sm:$0xff]   ;;  %v3731_v42 = vld [vmem:[#allocation5 + $0x4c8] ss:$16 sps:$4 sm:$0xff]  }
  0xad   :  { %1366 = vmatpush1.bf16.msra.mxu0 %v3644_v43  ;;  %1538 = vmatpush1.bf16.msra.mxu1 %v3647_v44  ;;  %v3736_v43 = vld [vmem:[#allocation5 + $0x4e4] ss:$16 sps:$4 sm:$0xff]   ;;  %v3739_v44 = vld [vmem:[#allocation5 + $0x4ec] ss:$16 sps:$4 sm:$0xff]  }
  0xae   :  { %1367 = vmatprep.subr.bf16.mxu0 %v3652_v45  ;;  %1539 = vmatprep.subr.bf16.mxu1 %v3655_v46  ;;  %v3734_v45 = vld [vmem:[#allocation5 + $0x4e0] ss:$16 sps:$4 sm:$0xff]   ;;  %v3737_v46 = vld [vmem:[#allocation5 + $0x4e8] ss:$16 sps:$4 sm:$0xff]  }
  0xb1   :  { %1368 = vmatpush1.bf16.msra.mxu0 %v3650_v47  ;;  %1540 = vmatpush1.bf16.msra.mxu1 %v3653_v48  ;;  %v3742_v47 = vld [vmem:[#allocation5 + $0x504] ss:$16 sps:$4 sm:$0xff]   ;;  %v3745_v48 = vld [vmem:[#allocation5 + $0x50c] ss:$16 sps:$4 sm:$0xff]  }
  0xb2   :  { %1369 = vmatprep.subr.bf16.mxu0 %v3658_v49  ;;  %1541 = vmatprep.subr.bf16.mxu1 %v3661_v50  ;;  %v3740_v49 = vld [vmem:[#allocation5 + $0x500] ss:$16 sps:$4 sm:$0xff]   ;;  %v3743_v50 = vld [vmem:[#allocation5 + $0x508] ss:$16 sps:$4 sm:$0xff]  }
  0xb5   :  { %1370 = vmatpush1.bf16.msra.mxu0 %v3656_v51  ;;  %1542 = vmatpush1.bf16.msra.mxu1 %v3659_v52  ;;  %v3748_v51 = vld [vmem:[#allocation5 + $0x524] ss:$16 sps:$4 sm:$0xff]   ;;  %v3751_v52 = vld [vmem:[#allocation5 + $0x52c] ss:$16 sps:$4 sm:$0xff]  }
  0xb6   :  { %1371 = vmatprep.subr.bf16.mxu0 %v3664_v53  ;;  %1543 = vmatprep.subr.bf16.mxu1 %v3667_v54  ;;  %v3746_v53 = vld [vmem:[#allocation5 + $0x520] ss:$16 sps:$4 sm:$0xff]   ;;  %v3749_v54 = vld [vmem:[#allocation5 + $0x528] ss:$16 sps:$4 sm:$0xff]  }
  0xb9   :  { %1372 = vmatpush1.bf16.msra.mxu0 %v3662_v55  ;;  %1544 = vmatpush1.bf16.msra.mxu1 %v3665_v56  ;;  %v3754_v55 = vld [vmem:[#allocation5 + $0x544] ss:$16 sps:$4 sm:$0xff]   ;;  %v3757_v56 = vld [vmem:[#allocation5 + $0x54c] ss:$16 sps:$4 sm:$0xff]  }
  0xba   :  { %1373 = vmatprep.subr.bf16.mxu0 %v3670_v57  ;;  %1545 = vmatprep.subr.bf16.mxu1 %v3673_v58  ;;  %v3752_v57 = vld [vmem:[#allocation5 + $0x540] ss:$16 sps:$4 sm:$0xff]   ;;  %v3755_v58 = vld [vmem:[#allocation5 + $0x548] ss:$16 sps:$4 sm:$0xff]  }
  0xbd   :  { %1374 = vmatpush1.bf16.msra.mxu0 %v3668_v59  ;;  %1546 = vmatpush1.bf16.msra.mxu1 %v3671_v60  ;;  %v3760_v59 = vld [vmem:[#allocation5 + $0x564] ss:$16 sps:$4 sm:$0xff]   ;;  %v3763_v60 = vld [vmem:[#allocation5 + $0x56c] ss:$16 sps:$4 sm:$0xff]  }
  0xbe   :  { %1375 = vmatprep.subr.bf16.mxu0 %v3676_v61  ;;  %1547 = vmatprep.subr.bf16.mxu1 %v3679_v62  ;;  %v3758_v61 = vld [vmem:[#allocation5 + $0x560] ss:$16 sps:$4 sm:$0xff]   ;;  %v3761_v62 = vld [vmem:[#allocation5 + $0x568] ss:$16 sps:$4 sm:$0xff]  }
  0xc1   :  { %1376 = vmatpush1.bf16.msra.mxu0 %v3674_v63  ;;  %1548 = vmatpush1.bf16.msra.mxu1 %v3677_v0  ;;  %v3766_v63 = vld [vmem:[#allocation5 + $0x584] ss:$16 sps:$4 sm:$0xff]   ;;  %v3769_v0 = vld [vmem:[#allocation5 + $0x58c] ss:$16 sps:$4 sm:$0xff]  }
  0xc2   :  { %1377 = vmatprep.subr.bf16.mxu0 %v3682_v1  ;;  %1549 = vmatprep.subr.bf16.mxu1 %v3685_v2  ;;  %v3764_v1 = vld [vmem:[#allocation5 + $0x580] ss:$16 sps:$4 sm:$0xff]   ;;  %v3767_v2 = vld [vmem:[#allocation5 + $0x588] ss:$16 sps:$4 sm:$0xff]  }
  0xc5   :  { %1378 = vmatpush1.bf16.msra.mxu0 %v3680_v3  ;;  %1550 = vmatpush1.bf16.msra.mxu1 %v3683_v4  ;;  %v3772_v3 = vld [vmem:[#allocation5 + $0x5a4] ss:$16 sps:$4 sm:$0xff]   ;;  %v3775_v4 = vld [vmem:[#allocation5 + $0x5ac] ss:$16 sps:$4 sm:$0xff]  }
  0xc6   :  { %1379 = vmatprep.subr.bf16.mxu0 %v3688_v5  ;;  %1551 = vmatprep.subr.bf16.mxu1 %v3691_v6  ;;  %v3770_v5 = vld [vmem:[#allocation5 + $0x5a0] ss:$16 sps:$4 sm:$0xff]   ;;  %v3773_v6 = vld [vmem:[#allocation5 + $0x5a8] ss:$16 sps:$4 sm:$0xff]  }
  0xc9   :  { %1380 = vmatpush1.bf16.msra.mxu0 %v3686_v7  ;;  %1552 = vmatpush1.bf16.msra.mxu1 %v3689_v8  ;;  %v3778_v7 = vld [vmem:[#allocation5 + $0x5c4] ss:$16 sps:$4 sm:$0xff]   ;;  %v3781_v8 = vld [vmem:[#allocation5 + $0x5cc] ss:$16 sps:$4 sm:$0xff]  }
  0xca   :  { %1392 = vmatprep.subr.bf16.mxu0 %v3694_v9  ;;  %1564 = vmatprep.subr.bf16.mxu1 %v3697_v12  ;;  %v3776_v9 = vld [vmem:[#allocation5 + $0x5c0] ss:$16 sps:$4 sm:$0xff]   ;;  %v3787_v12 = vld [vmem:[#allocation5 + $0x5ec] ss:$16 sps:$4 sm:$0xff]  }
  0xcc   :  { %1382 = vmatmul.mubr.bf16.vlgmr.msra.gmra.mrb[0].mxu0 %v99_v15  ;;  %1554 = vmatmul.mubr.bf16.vlgmr.msra.gmra.mrb[0].mxu1 %v99_v15  ;;  %v87_v15 = vld [vmem:[#allocation2 + $0x20] sm:$0xff] }
  0xcd   :  { %1393 = vmatpush1.bf16.msra.mxu0 %v3692_v13  ;;  %1565 = vmatpush1.bf16.msra.mxu1 %v3695_v14  ;;  %v3782_v13 = vld [vmem:[#allocation5 + $0x5e0] ss:$16 sps:$4 sm:$0xff]   ;;  %v3785_v14 = vld [vmem:[#allocation5 + $0x5e8] ss:$16 sps:$4 sm:$0xff]  }
  0xce   :  { %1394 = vmatprep.subr.bf16.mxu0 %v3700_v16  ;;  %1566 = vmatprep.subr.bf16.mxu1 %v3703_v17  ;;  %v94_v16 = vld [vmem:[#allocation2 + $0x58] sm:$0xff]  ;;  %v3790_v17 = vld [vmem:[#allocation5 + $0x604] ss:$16 sps:$4 sm:$0xff]  }
  0xcf   :  { %1424 = vmatprep.mubr.bf16.mxu0 %v102_v23  ;;  %1596 = vmatprep.mubr.bf16.mxu1 %v102_v23  ;;  %v101_v21 = vpack.c.bf16 %v94_v16, %v87_v15  ;;  %v3799_v23 = vld [vmem:[#allocation7 + $0xc] ss:$16 sps:$4 sm:$0xff]   ;;  %v3872_v16 = vld [vmem:[#allocation7 + $0x1a0] ss:$16 sps:$4 sm:$0xff]  }
  0xd0   :  { %v3877_v15 = vld [vmem:[#allocation7 + $0x1ac] ss:$16 sps:$4 sm:$0xff]  }
  0xd1   :  { %1395 = vmatpush1.bf16.msra.mxu0 %v3698_v19  ;;  %1567 = vmatpush1.bf16.msra.mxu1 %v3701_v20  ;;  %v3788_v19 = vld [vmem:[#allocation5 + $0x600] ss:$16 sps:$4 sm:$0xff]   ;;  %v3791_v20 = vld [vmem:[#allocation5 + $0x608] ss:$16 sps:$4 sm:$0xff]  }
  0xd2   :  { %1396 = vmatprep.subr.bf16.mxu0 %v3706_v22  ;;  %1568 = vmatprep.subr.bf16.mxu1 %v3709_v24  ;;  %v3796_v22 = vld [vmem:[#allocation7 + $0x4] ss:$16 sps:$4 sm:$0xff]   ;;  %v4154_v24 = vmov 0  }
  0xd5   :  { %1397 = vmatpush1.bf16.msra.mxu0 %v3704_v25  ;;  %1569 = vmatpush1.bf16.msra.mxu1 %v3707_v26  ;;  %v89_v25 = vld [vmem:[#allocation2 + $0x30] sm:$0xff]  ;;  %v96_v26 = vld [vmem:[#allocation2 + $0x68] sm:$0xff] }
  0xd6   :  { %1398 = vmatprep.subr.bf16.mxu0 %v3712_v27  ;;  %1570 = vmatprep.subr.bf16.mxu1 %v3715_v28  ;;  %v3794_v27 = vld [vmem:[#allocation7] ss:$16 sps:$4 sm:$0xff]   ;;  %v3797_v28 = vld [vmem:[#allocation7 + $0x8] ss:$16 sps:$4 sm:$0xff]  }
  0xd9   :  { %1399 = vmatpush1.bf16.msra.mxu0 %v3710_v29  ;;  %1571 = vmatpush1.bf16.msra.mxu1 %v3713_v30  ;;  %v103_v29 = vpack.c.bf16 %v96_v26, %v89_v25  ;;  %v3802_v30 = vld [vmem:[#allocation7 + $0x24] ss:$16 sps:$4 sm:$0xff]   ;;  %v3887_v25 = vld [vmem:[#allocation7 + $0x1e8] ss:$16 sps:$4 sm:$0xff]  }
  0xda   :  { %1400 = vmatprep.subr.bf16.mxu0 %v3718_v31  ;;  %1572 = vmatprep.subr.bf16.mxu1 %v3721_v32  ;;  %v3805_v31 = vld [vmem:[#allocation7 + $0x2c] ss:$16 sps:$4 sm:$0xff]   ;;  %v3800_v32 = vld [vmem:[#allocation7 + $0x20] ss:$16 sps:$4 sm:$0xff]   ;;  %v3892_v26 = vld [vmem:[#allocation7 + $0x204] ss:$16 sps:$4 sm:$0xff]  }
  0xdd   :  { %1401 = vmatpush1.bf16.msra.mxu0 %v3716_v33  ;;  %1573 = vmatpush1.bf16.msra.mxu1 %v3719_v34  ;;  %v3803_v33 = vld [vmem:[#allocation7 + $0x28] ss:$16 sps:$4 sm:$0xff]   ;;  %v3808_v34 = vld [vmem:[#allocation7 + $0x44] ss:$16 sps:$4 sm:$0xff]  }
  0xde   :  { %1402 = vmatprep.subr.bf16.mxu0 %v3724_v35  ;;  %1574 = vmatprep.subr.bf16.mxu1 %v3727_v36  ;;  %v3811_v35 = vld [vmem:[#allocation7 + $0x4c] ss:$16 sps:$4 sm:$0xff]   ;;  %v3806_v36 = vld [vmem:[#allocation7 + $0x40] ss:$16 sps:$4 sm:$0xff]  }
  0xe1   :  { %1403 = vmatpush1.bf16.msra.mxu0 %v3722_v37  ;;  %1575 = vmatpush1.bf16.msra.mxu1 %v3725_v38  ;;  %v3809_v37 = vld [vmem:[#allocation7 + $0x48] ss:$16 sps:$4 sm:$0xff]   ;;  %v3814_v38 = vld [vmem:[#allocation7 + $0x64] ss:$16 sps:$4 sm:$0xff]  }
  0xe2   :  { %1404 = vmatprep.subr.bf16.mxu0 %v3730_v39  ;;  %1576 = vmatprep.subr.bf16.mxu1 %v3733_v40  ;;  %v3817_v39 = vld [vmem:[#allocation7 + $0x6c] ss:$16 sps:$4 sm:$0xff]   ;;  %v3812_v40 = vld [vmem:[#allocation7 + $0x60] ss:$16 sps:$4 sm:$0xff]  }
  0xe5   :  { %1405 = vmatpush1.bf16.msra.mxu0 %v3728_v41  ;;  %1577 = vmatpush1.bf16.msra.mxu1 %v3731_v42  ;;  %v3815_v41 = vld [vmem:[#allocation7 + $0x68] ss:$16 sps:$4 sm:$0xff]   ;;  %v3820_v42 = vld [vmem:[#allocation7 + $0x84] ss:$16 sps:$4 sm:$0xff]  }
  0xe6   :  { %1406 = vmatprep.subr.bf16.mxu0 %v3736_v43  ;;  %1578 = vmatprep.subr.bf16.mxu1 %v3739_v44  ;;  %v3823_v43 = vld [vmem:[#allocation7 + $0x8c] ss:$16 sps:$4 sm:$0xff]   ;;  %v3818_v44 = vld [vmem:[#allocation7 + $0x80] ss:$16 sps:$4 sm:$0xff]  }
  0xe9   :  { %1407 = vmatpush1.bf16.msra.mxu0 %v3734_v45  ;;  %1579 = vmatpush1.bf16.msra.mxu1 %v3737_v46  ;;  %v3821_v45 = vld [vmem:[#allocation7 + $0x88] ss:$16 sps:$4 sm:$0xff]   ;;  %v3826_v46 = vld [vmem:[#allocation7 + $0xa4] ss:$16 sps:$4 sm:$0xff]  }
  0xea   :  { %1408 = vmatprep.subr.bf16.mxu0 %v3742_v47  ;;  %1580 = vmatprep.subr.bf16.mxu1 %v3745_v48  ;;  %v3829_v47 = vld [vmem:[#allocation7 + $0xac] ss:$16 sps:$4 sm:$0xff]   ;;  %v3824_v48 = vld [vmem:[#allocation7 + $0xa0] ss:$16 sps:$4 sm:$0xff]  }
  0xed   :  { %1409 = vmatpush1.bf16.msra.mxu0 %v3740_v49  ;;  %1581 = vmatpush1.bf16.msra.mxu1 %v3743_v50  ;;  %v3827_v49 = vld [vmem:[#allocation7 + $0xa8] ss:$16 sps:$4 sm:$0xff]   ;;  %v3832_v50 = vld [vmem:[#allocation7 + $0xc4] ss:$16 sps:$4 sm:$0xff]  }
  0xee   :  { %1410 = vmatprep.subr.bf16.mxu0 %v3748_v51  ;;  %1582 = vmatprep.subr.bf16.mxu1 %v3751_v52  ;;  %v3835_v51 = vld [vmem:[#allocation7 + $0xcc] ss:$16 sps:$4 sm:$0xff]   ;;  %v3830_v52 = vld [vmem:[#allocation7 + $0xc0] ss:$16 sps:$4 sm:$0xff]  }
  0xf1   :  { %1411 = vmatpush1.bf16.msra.mxu0 %v3746_v53  ;;  %1583 = vmatpush1.bf16.msra.mxu1 %v3749_v54  ;;  %v3833_v53 = vld [vmem:[#allocation7 + $0xc8] ss:$16 sps:$4 sm:$0xff]   ;;  %v3838_v54 = vld [vmem:[#allocation7 + $0xe4] ss:$16 sps:$4 sm:$0xff]  }
  0xf2   :  { %1412 = vmatprep.subr.bf16.mxu0 %v3754_v55  ;;  %1584 = vmatprep.subr.bf16.mxu1 %v3757_v56  ;;  %v3841_v55 = vld [vmem:[#allocation7 + $0xec] ss:$16 sps:$4 sm:$0xff]   ;;  %v3836_v56 = vld [vmem:[#allocation7 + $0xe0] ss:$16 sps:$4 sm:$0xff]  }
  0xf5   :  { %1413 = vmatpush1.bf16.msra.mxu0 %v3752_v57  ;;  %1585 = vmatpush1.bf16.msra.mxu1 %v3755_v58  ;;  %v3839_v57 = vld [vmem:[#allocation7 + $0xe8] ss:$16 sps:$4 sm:$0xff]   ;;  %v3844_v58 = vld [vmem:[#allocation7 + $0x104] ss:$16 sps:$4 sm:$0xff]  }
  0xf6   :  { %1414 = vmatprep.subr.bf16.mxu0 %v3760_v59  ;;  %1586 = vmatprep.subr.bf16.mxu1 %v3763_v60  ;;  %v3847_v59 = vld [vmem:[#allocation7 + $0x10c] ss:$16 sps:$4 sm:$0xff]   ;;  %v3842_v60 = vld [vmem:[#allocation7 + $0x100] ss:$16 sps:$4 sm:$0xff]  }
  0xf9   :  { %1415 = vmatpush1.bf16.msra.mxu0 %v3758_v61  ;;  %1587 = vmatpush1.bf16.msra.mxu1 %v3761_v62  ;;  %v3845_v61 = vld [vmem:[#allocation7 + $0x108] ss:$16 sps:$4 sm:$0xff]   ;;  %v3850_v62 = vld [vmem:[#allocation7 + $0x124] ss:$16 sps:$4 sm:$0xff]  }
  0xfa   :  { %1416 = vmatprep.subr.bf16.mxu0 %v3766_v63  ;;  %1588 = vmatprep.subr.bf16.mxu1 %v3769_v0  ;;  %v3853_v63 = vld [vmem:[#allocation7 + $0x12c] ss:$16 sps:$4 sm:$0xff]   ;;  %v3848_v0 = vld [vmem:[#allocation7 + $0x120] ss:$16 sps:$4 sm:$0xff]  }
  0xfd   :  { %1417 = vmatpush1.bf16.msra.mxu0 %v3764_v1  ;;  %1589 = vmatpush1.bf16.msra.mxu1 %v3767_v2  ;;  %v3851_v1 = vld [vmem:[#allocation7 + $0x128] ss:$16 sps:$4 sm:$0xff]   ;;  %v3856_v2 = vld [vmem:[#allocation7 + $0x144] ss:$16 sps:$4 sm:$0xff]  }
  0xfe   :  { %1418 = vmatprep.subr.bf16.mxu0 %v3772_v3  ;;  %1590 = vmatprep.subr.bf16.mxu1 %v3775_v4  ;;  %v3859_v3 = vld [vmem:[#allocation7 + $0x14c] ss:$16 sps:$4 sm:$0xff]   ;;  %v3854_v4 = vld [vmem:[#allocation7 + $0x140] ss:$16 sps:$4 sm:$0xff]  }
 0x101   :  { %1419 = vmatpush1.bf16.msra.mxu0 %v3770_v5  ;;  %1591 = vmatpush1.bf16.msra.mxu1 %v3773_v6  ;;  %v3857_v5 = vld [vmem:[#allocation7 + $0x148] ss:$16 sps:$4 sm:$0xff]   ;;  %v3862_v6 = vld [vmem:[#allocation7 + $0x164] ss:$16 sps:$4 sm:$0xff]  }
 0x102   :  { %1420 = vmatprep.subr.bf16.mxu0 %v3778_v7  ;;  %1592 = vmatprep.subr.bf16.mxu1 %v3781_v8  ;;  %v3865_v7 = vld [vmem:[#allocation7 + $0x16c] ss:$16 sps:$4 sm:$0xff]   ;;  %v3860_v8 = vld [vmem:[#allocation7 + $0x160] ss:$16 sps:$4 sm:$0xff]  }
 0x105   :  { %1421 = vmatpush1.bf16.msra.mxu0 %v3776_v9  ;;  %1593 = vmatpush1.bf16.msra.mxu1 %v3779_v10  ;;  %v3863_v9 = vld [vmem:[#allocation7 + $0x168] ss:$16 sps:$4 sm:$0xff]   ;;  %v3868_v10 = vld [vmem:[#allocation7 + $0x184] ss:$16 sps:$4 sm:$0xff]  }
 0x106   :  { %1422 = vmatprep.subr.bf16.mxu0 %v3784_v11  ;;  %1594 = vmatprep.subr.bf16.mxu1 %v3787_v12  ;;  %v3871_v11 = vld [vmem:[#allocation7 + $0x18c] ss:$16 sps:$4 sm:$0xff]   ;;  %v3866_v12 = vld [vmem:[#allocation7 + $0x180] ss:$16 sps:$4 sm:$0xff]  }
 0x109   :  { %1423 = vmatpush1.bf16.msra.mxu0 %v3782_v13  ;;  %1595 = vmatpush1.bf16.msra.mxu1 %v3785_v14  ;;  %v3869_v13 = vld [vmem:[#allocation7 + $0x188] ss:$16 sps:$4 sm:$0xff]   ;;  %v3874_v14 = vld [vmem:[#allocation7 + $0x1a4] ss:$16 sps:$4 sm:$0xff]  }
 0x10a   :  { %1435 = vmatprep.subr.bf16.mxu0 %v3790_v17  ;;  %1607 = vmatprep.subr.bf16.mxu1 %v3793_v18  ;;  %v3875_v17 = vld [vmem:[#allocation7 + $0x1a8] ss:$16 sps:$4 sm:$0xff]   ;;  %v3880_v18 = vld [vmem:[#allocation7 + $0x1c4] ss:$16 sps:$4 sm:$0xff]  }
 0x10c   :  { %1425 = vmatmul.mubr.bf16.vlgmr.msra.gmra.mrb[0].mxu0 %v101_v21  ;;  %1597 = vmatmul.mubr.bf16.vlgmr.msra.gmra.mrb[0].mxu1 %v101_v21  ;;  %v3881_v21 = vld [vmem:[#allocation7 + $0x1c8] ss:$16 sps:$4 sm:$0xff]  }
 0x10d   :  { %1436 = vmatpush1.bf16.msra.mxu0 %v3788_v19  ;;  %1608 = vmatpush1.bf16.msra.mxu1 %v3791_v20  ;;  %v3883_v19 = vld [vmem:[#allocation7 + $0x1cc] ss:$16 sps:$4 sm:$0xff]   ;;  %v3878_v20 = vld [vmem:[#allocation7 + $0x1c0] ss:$16 sps:$4 sm:$0xff]  }
 0x10e   :  { %1467 = vmatprep.mubr.bf16.mxu0 %v4154_v24  ;;  %1639 = vmatprep.mubr.bf16.mxu1 %v4154_v24  ;;  %v3884_v24 = vld [vmem:[#allocation7 + $0x1e0] ss:$16 sps:$4 sm:$0xff]  }
 0x10f   :  { %2452 = vmatprep.subr.bf16.mxu0 %v3796_v22  ;;  %2538 = vmatprep.subr.bf16.mxu1 %v3799_v23  ;;  %v3886_v22 = vld [vmem:[#allocation7 + $0x1e4] ss:$16 sps:$4 sm:$0xff]   ;;  %v3889_v23 = vld [vmem:[#allocation7 + $0x1ec] ss:$16 sps:$4 sm:$0xff]  }
 0x118   :  { %3224 = vmatmul.mubr.msk.bf16.vlgmr.msra.gmra.mrb[0].mxu0 %vm1302_vm0, %v103_v29  ;;  %3225 = vmatmul.mubr.msk.bf16.vlgmr.msra.gmra.mrb[0].mxu1 %vm1302_vm0, %v103_v29 }
 0x119   :  { %2453 = vmatpush1.bf16.msra.mxu0 %v3794_v27  ;;  %2539 = vmatpush1.bf16.msra.mxu1 %v3797_v28  ;;  %v3895_v27 = vld [vmem:[#allocation7 + $0x20c] ss:$16 sps:$4 sm:$0xff]   ;;  %v302_v28 = vlaneseq }
 0x11a   :  { %2454 = vmatprep.subr.bf16.mxu0 %v3802_v30  ;;  %2540 = vmatprep.subr.bf16.mxu1 %v3805_v31 }
 0x11b   :  { %v4262_v29 = vshrl.u32 %v302_v28, 7  ;;  %v3929_v28 = vld [vmem:[#allocation7 + $0x2c8] ss:$16 sps:$4 sm:$0xff]  }
 0x11d   :  { %2455 = vmatpush1.bf16.msra.mxu0 %v3800_v32  ;;  %2541 = vmatpush1.bf16.msra.mxu1 %v3803_v33  ;;  %v304_v30 = vsub.s32 0, %v4262_v29  ;;  %v312_v31 = vsub.s32 2, %v4262_v29  ;;  %v300_v32 = vld [vmem:[%s4314_s2] sm:$0xf]  ;;  %v308_v33 = vsub.s32 1, %v4262_v29 }
 0x11e   :  { %2456 = vmatprep.subr.bf16.mxu0 %v3808_v34  ;;  %2542 = vmatprep.subr.bf16.mxu1 %v3811_v35  ;;  %v316_v34 = vsub.s32 3, %v4262_v29 }
 0x11f   :  { %v305_v35 = vrot.slane %v300_v32, %v304_v30 }
 0x121   :  { %2457 = vmatpush1.bf16.msra.mxu0 %v3806_v36  ;;  %2543 = vmatpush1.bf16.msra.mxu1 %v3809_v37  ;;  %v313_v36 = vrot.slane %v300_v32, %v312_v31  ;;  %v309_v37 = vrot.slane %v300_v32, %v308_v33 }
 0x122   :  { %2458 = vmatprep.subr.bf16.mxu0 %v3814_v38  ;;  %2544 = vmatprep.subr.bf16.mxu1 %v3817_v39  ;;  %v317_v38 = vrot.slane %v300_v32, %v316_v34  ;;  %v3934_v32 = vld [vmem:[#allocation7 + $0x2e4] ss:$16 sps:$4 sm:$0xff]  }
 0x125   :  { %2459 = vmatpush1.bf16.msra.mxu0 %v3812_v40  ;;  %2545 = vmatpush1.bf16.msra.mxu1 %v3815_v41 }
 0x126   :  { %2460 = vmatprep.subr.bf16.mxu0 %v3820_v42  ;;  %2546 = vmatprep.subr.bf16.mxu1 %v3823_v43 }
 0x129   :  { %2461 = vmatpush1.bf16.msra.mxu0 %v3818_v44  ;;  %2547 = vmatpush1.bf16.msra.mxu1 %v3821_v45 }
 0x12a   :  { %2462 = vmatprep.subr.bf16.mxu0 %v3826_v46  ;;  %2548 = vmatprep.subr.bf16.mxu1 %v3829_v47 }
 0x12d   :  { %2463 = vmatpush1.bf16.msra.mxu0 %v3824_v48  ;;  %2549 = vmatpush1.bf16.msra.mxu1 %v3827_v49 }
 0x12e   :  { %2464 = vmatprep.subr.bf16.mxu0 %v3832_v50  ;;  %2550 = vmatprep.subr.bf16.mxu1 %v3835_v51 }
 0x131   :  { %2465 = vmatpush1.bf16.msra.mxu0 %v3830_v52  ;;  %2551 = vmatpush1.bf16.msra.mxu1 %v3833_v53 }
 0x132   :  { %2466 = vmatprep.subr.bf16.mxu0 %v3838_v54  ;;  %2552 = vmatprep.subr.bf16.mxu1 %v3841_v55 }
 0x135   :  { %2467 = vmatpush1.bf16.msra.mxu0 %v3836_v56  ;;  %2553 = vmatpush1.bf16.msra.mxu1 %v3839_v57 }
 0x136   :  { %2468 = vmatprep.subr.bf16.mxu0 %v3844_v58  ;;  %2554 = vmatprep.subr.bf16.mxu1 %v3847_v59 }
 0x139   :  { %2469 = vmatpush1.bf16.msra.mxu0 %v3842_v60  ;;  %2555 = vmatpush1.bf16.msra.mxu1 %v3845_v61 }
 0x13a   :  { %2470 = vmatprep.subr.bf16.mxu0 %v3850_v62  ;;  %2556 = vmatprep.subr.bf16.mxu1 %v3853_v63 }
 0x13d   :  { %2471 = vmatpush1.bf16.msra.mxu0 %v3848_v0  ;;  %2557 = vmatpush1.bf16.msra.mxu1 %v3851_v1 }
 0x13e   :  { %2472 = vmatprep.subr.bf16.mxu0 %v3856_v2  ;;  %2558 = vmatprep.subr.bf16.mxu1 %v3859_v3  ;;  %v3890_v3 = vld [vmem:[#allocation7 + $0x200] ss:$16 sps:$4 sm:$0xff]  }
 0x141   :  { %2473 = vmatpush1.bf16.msra.mxu0 %v3854_v4  ;;  %2559 = vmatpush1.bf16.msra.mxu1 %v3857_v5  ;;  %v3893_v4 = vld [vmem:[#allocation7 + $0x208] ss:$16 sps:$4 sm:$0xff]   ;;  %v3898_v5 = vld [vmem:[#allocation7 + $0x224] ss:$16 sps:$4 sm:$0xff]  }
 0x142   :  { %2474 = vmatprep.subr.bf16.mxu0 %v3862_v6  ;;  %2560 = vmatprep.subr.bf16.mxu1 %v3865_v7  ;;  %v3901_v6 = vld [vmem:[#allocation7 + $0x22c] ss:$16 sps:$4 sm:$0xff]   ;;  %v3896_v7 = vld [vmem:[#allocation7 + $0x220] ss:$16 sps:$4 sm:$0xff]  }
 0x145   :  { %2475 = vmatpush1.bf16.msra.mxu0 %v3860_v8  ;;  %2561 = vmatpush1.bf16.msra.mxu1 %v3863_v9  ;;  %v3899_v8 = vld [vmem:[#allocation7 + $0x228] ss:$16 sps:$4 sm:$0xff]   ;;  %v3904_v9 = vld [vmem:[#allocation7 + $0x244] ss:$16 sps:$4 sm:$0xff]  }
 0x146   :  { %2476 = vmatprep.subr.bf16.mxu0 %v3868_v10  ;;  %2562 = vmatprep.subr.bf16.mxu1 %v3871_v11  ;;  %v3907_v10 = vld [vmem:[#allocation7 + $0x24c] ss:$16 sps:$4 sm:$0xff]   ;;  %v3902_v11 = vld [vmem:[#allocation7 + $0x240] ss:$16 sps:$4 sm:$0xff]  }
 0x149   :  { %2477 = vmatpush1.bf16.msra.mxu0 %v3866_v12  ;;  %2563 = vmatpush1.bf16.msra.mxu1 %v3869_v13  ;;  %v3905_v12 = vld [vmem:[#allocation7 + $0x248] ss:$16 sps:$4 sm:$0xff]   ;;  %v3910_v13 = vld [vmem:[#allocation7 + $0x264] ss:$16 sps:$4 sm:$0xff]  }
 0x14a   :  { %2478 = vmatprep.subr.bf16.mxu0 %v3874_v14  ;;  %2564 = vmatprep.subr.bf16.mxu1 %v3877_v15  ;;  %v3913_v14 = vld [vmem:[#allocation7 + $0x26c] ss:$16 sps:$4 sm:$0xff]   ;;  %v3908_v15 = vld [vmem:[#allocation7 + $0x260] ss:$16 sps:$4 sm:$0xff]  }
 0x14d   :  { %2479 = vmatpush1.bf16.msra.mxu0 %v3872_v16  ;;  %2565 = vmatpush1.bf16.msra.mxu1 %v3875_v17  ;;  %v3911_v16 = vld [vmem:[#allocation7 + $0x268] ss:$16 sps:$4 sm:$0xff]   ;;  %v3916_v17 = vld [vmem:[#allocation7 + $0x284] ss:$16 sps:$4 sm:$0xff]  }
 0x14e   :  { %2480 = vmatprep.subr.bf16.mxu0 %v3880_v18  ;;  %2566 = vmatprep.subr.bf16.mxu1 %v3883_v19  ;;  %v3919_v18 = vld [vmem:[#allocation7 + $0x28c] ss:$16 sps:$4 sm:$0xff]   ;;  %v3914_v19 = vld [vmem:[#allocation7 + $0x280] ss:$16 sps:$4 sm:$0xff]  }
 0x151   :  { %2481 = vmatpush1.bf16.msra.mxu0 %v3878_v20  ;;  %2567 = vmatpush1.bf16.msra.mxu1 %v3881_v21  ;;  %v3917_v20 = vld [vmem:[#allocation7 + $0x288] ss:$16 sps:$4 sm:$0xff]   ;;  %v3922_v21 = vld [vmem:[#allocation7 + $0x2a4] ss:$16 sps:$4 sm:$0xff]  }
 0x152   :  { %2482 = vmatprep.subr.bf16.mxu0 %v3886_v22  ;;  %2568 = vmatprep.subr.bf16.mxu1 %v3889_v23  ;;  %v3925_v22 = vld [vmem:[#allocation7 + $0x2ac] ss:$16 sps:$4 sm:$0xff]   ;;  %v3920_v23 = vld [vmem:[#allocation7 + $0x2a0] ss:$16 sps:$4 sm:$0xff]  }
 0x155   :  { %2483 = vmatpush1.bf16.msra.mxu0 %v3884_v24  ;;  %2569 = vmatpush1.bf16.msra.mxu1 %v3887_v25  ;;  %v3923_v24 = vld [vmem:[#allocation7 + $0x2a8] ss:$16 sps:$4 sm:$0xff]   ;;  %v3928_v25 = vld [vmem:[#allocation7 + $0x2c4] ss:$16 sps:$4 sm:$0xff]  }
 0x156   :  { %2495 = vmatprep.subr.bf16.mxu0 %v3892_v26  ;;  %2581 = vmatprep.subr.bf16.mxu1 %v3895_v27  ;;  %v3931_v26 = vld [vmem:[#allocation7 + $0x2cc] ss:$16 sps:$4 sm:$0xff]   ;;  %v3926_v27 = vld [vmem:[#allocation7 + $0x2c0] ss:$16 sps:$4 sm:$0xff]  }
 0x1eb   :  { %v1469_v39 = vpop.f32.mrb[0].mxu0  ;;  %v1641_v40 = vpop.f32.mrb[0].mxu1 }
 0x1ec   :  { %v3440_v41 = vadd.f32 %v1469_v39, %v305_v35  ;;  %v3444_v42 = vadd.f32 %v1641_v40, %v313_v36  ;;  %v1471_v43 = vpop.f32.mrb[1].mxu0  ;;  %v1643_v44 = vpop.f32.mrb[1].mxu1  ;;  %v3943_v39 = vld [vmem:[#allocation7 + $0x30c] ss:$16 sps:$4 sm:$0xff]   ;;  %v3938_v40 = vld [vmem:[#allocation7 + $0x300] ss:$16 sps:$4 sm:$0xff]  }
 0x1ed   :  { %v3441_v45 = vadd.f32 %v1471_v43, %v309_v37  ;;  %v3445_v46 = vadd.f32 %v1643_v44, %v317_v38  ;;  %v1473_v47 = vpop.f32.mrb[2].mxu0  ;;  %v1645_v48 = vpop.f32.mrb[2].mxu1  ;;  %v3949_v43 = vld [vmem:[#allocation7 + $0x32c] ss:$16 sps:$4 sm:$0xff]   ;;  %v3944_v44 = vld [vmem:[#allocation7 + $0x320] ss:$16 sps:$4 sm:$0xff]  }
 0x1ee   :  { %v3442_v49 = vadd.f32 %v1473_v47, %v305_v35  ;;  %v3446_v50 = vadd.f32 %v1645_v48, %v313_v36  ;;  %v1475_v51 = vpop.f32.mrb[3].mxu0  ;;  %v1647_v52 = vpop.f32.mrb[3].mxu1  ;;  %v1650_v55 = vmax.f32 %v3440_v41, 0.0  ;;  %v1652_v56 = vmax.f32 %v3444_v42, 0.0  ;;  %v3937_v35 = vld [vmem:[#allocation7 + $0x2ec] ss:$16 sps:$4 sm:$0xff]  }
 0x1ef   :  { %v3443_v53 = vadd.f32 %v1475_v51, %v309_v37  ;;  %v3447_v54 = vadd.f32 %v1647_v52, %v317_v38  ;;  %v1651_v59 = vmax.f32 %v3441_v45, 0.0  ;;  %v1653_v60 = vmax.f32 %v3445_v46, 0.0  ;;  %v3932_v36 = vld [vmem:[#allocation7 + $0x2e0] ss:$16 sps:$4 sm:$0xff]   ;;  %v3935_v37 = vld [vmem:[#allocation7 + $0x2e8] ss:$16 sps:$4 sm:$0xff]  }
 0x1f0   :  { %v1654_v57 = vmax.f32 %v3442_v49, 0.0  ;;  %v1656_v58 = vmax.f32 %v3446_v50, 0.0  ;;  %v3940_v38 = vld [vmem:[#allocation7 + $0x304] ss:$16 sps:$4 sm:$0xff]   ;;  %v3941_v41 = vld [vmem:[#allocation7 + $0x308] ss:$16 sps:$4 sm:$0xff]  }
 0x1f1   :  { %v1655_v61 = vmax.f32 %v3443_v53, 0.0  ;;  %v1657_v62 = vmax.f32 %v3447_v54, 0.0  ;;  %v3946_v42 = vld [vmem:[#allocation7 + $0x324] ss:$16 sps:$4 sm:$0xff]   ;;  %v3947_v45 = vld [vmem:[#allocation7 + $0x328] ss:$16 sps:$4 sm:$0xff]  }
 0x1f2   :  { %v1658_v63 = vpack.c.bf16 %v1654_v57, %v1650_v55  ;;  %v4279_v0 = vpack.c.bf16 %v1656_v58, %v1652_v56  ;;  %v3952_v46 = vld [vmem:[#allocation7 + $0x344] ss:$16 sps:$4 sm:$0xff]   ;;  %v3955_v47 = vld [vmem:[#allocation7 + $0x34c] ss:$16 sps:$4 sm:$0xff]   ;;  %v3950_v48 = vld [vmem:[#allocation7 + $0x340] ss:$16 sps:$4 sm:$0xff]  }
 0x1f3   :  { %v1659_v1 = vpack.c.bf16 %v1655_v61, %v1651_v59  ;;  %v1661_v2 = vpack.c.bf16 %v1657_v62, %v1653_v60  ;;  %v3953_v49 = vld [vmem:[#allocation7 + $0x348] ss:$16 sps:$4 sm:$0xff]   ;;  %v3958_v50 = vld [vmem:[#allocation7 + $0x364] ss:$16 sps:$4 sm:$0xff]   ;;  %v3961_v51 = vld [vmem:[#allocation7 + $0x36c] ss:$16 sps:$4 sm:$0xff]  }
 0x1f4   :  { %v3956_v52 = vld [vmem:[#allocation7 + $0x360] ss:$16 sps:$4 sm:$0xff]   ;;  %v3959_v53 = vld [vmem:[#allocation7 + $0x368] ss:$16 sps:$4 sm:$0xff]   ;;  %v3964_v54 = vld [vmem:[#allocation7 + $0x384] ss:$16 sps:$4 sm:$0xff]  }
 0x1f5   :  { %2484 = vmatprep.mubr.bf16.mxu0 %v1659_v1  ;;  %2570 = vmatprep.mubr.bf16.mxu1 %v1659_v1  ;;  %v3967_v55 = vld [vmem:[#allocation7 + $0x38c] ss:$16 sps:$4 sm:$0xff]   ;;  %v3962_v56 = vld [vmem:[#allocation7 + $0x380] ss:$16 sps:$4 sm:$0xff]   ;;  %v3965_v57 = vld [vmem:[#allocation7 + $0x388] ss:$16 sps:$4 sm:$0xff]  }
 0x1f6   :  { %2485 = vmatmul.mubr.bf16.vlgmr.msra.gmra.mrb[4].mxu0 %v1658_v63  ;;  %2571 = vmatmul.mubr.bf16.vlgmr.msra.gmra.mrb[4].mxu1 %v1658_v63  ;;  %v3970_v58 = vld [vmem:[#allocation7 + $0x3a4] ss:$16 sps:$4 sm:$0xff]   ;;  %v3973_v59 = vld [vmem:[#allocation7 + $0x3ac] ss:$16 sps:$4 sm:$0xff]   ;;  %v3968_v60 = vld [vmem:[#allocation7 + $0x3a0] ss:$16 sps:$4 sm:$0xff]  }
 0x1f7   :  { %2496 = vmatpush1.bf16.msra.mxu0 %v3890_v3  ;;  %2582 = vmatpush1.bf16.msra.mxu1 %v3893_v4  ;;  %v3971_v61 = vld [vmem:[#allocation7 + $0x3a8] ss:$16 sps:$4 sm:$0xff]   ;;  %v3976_v62 = vld [vmem:[#allocation7 + $0x3c4] ss:$16 sps:$4 sm:$0xff]   ;;  %v3979_v63 = vld [vmem:[#allocation7 + $0x3cc] ss:$16 sps:$4 sm:$0xff]  }
 0x1f8   :  { %2527 = vmatprep.mubr.bf16.mxu0 %v1661_v2  ;;  %2613 = vmatprep.mubr.bf16.mxu1 %v1661_v2  ;;  %v3974_v1 = vld [vmem:[#allocation7 + $0x3c0] ss:$16 sps:$4 sm:$0xff]   ;;  %v3977_v2 = vld [vmem:[#allocation7 + $0x3c8] ss:$16 sps:$4 sm:$0xff]   ;;  %v3982_v3 = vld [vmem:[#allocation7 + $0x3e4] ss:$16 sps:$4 sm:$0xff]  }
 0x1f9   :  { %2497 = vmatprep.subr.bf16.mxu0 %v3898_v5  ;;  %2583 = vmatprep.subr.bf16.mxu1 %v3901_v6  ;;  %v3985_v4 = vld [vmem:[#allocation7 + $0x3ec] ss:$16 sps:$4 sm:$0xff]   ;;  %v3980_v5 = vld [vmem:[#allocation7 + $0x3e0] ss:$16 sps:$4 sm:$0xff]   ;;  %v3983_v6 = vld [vmem:[#allocation7 + $0x3e8] ss:$16 sps:$4 sm:$0xff]  }
 0x1fb   :  { %2498 = vmatpush1.bf16.msra.mxu0 %v3896_v7  ;;  %2584 = vmatpush1.bf16.msra.mxu1 %v3899_v8  ;;  %v3986_v7 = vld [vmem:[#allocation8 + $0x40] sm:$0xff]  }
 0x1fc   :  { %2499 = vmatprep.subr.bf16.mxu0 %v3904_v9  ;;  %2585 = vmatprep.subr.bf16.mxu1 %v3907_v10  ;;  %v3987_v8 = vld [vmem:[#allocation8 + $0xc0] sm:$0xff]  }
 0x1fd   :  { %v3988_v9 = vld [vmem:[#allocation8] sm:$0xff]  }
 0x1fe   :  { %v3989_v10 = vld [vmem:[#allocation8 + $0x80] sm:$0xff]  }
 0x1ff   :  { %2500 = vmatpush1.bf16.msra.mxu0 %v3902_v11  ;;  %2586 = vmatpush1.bf16.msra.mxu1 %v3905_v12  ;;  %v3990_v11 = vld [vmem:[#allocation8 + $0x48] sm:$0xff]  }
 0x200   :  { %2501 = vmatprep.subr.bf16.mxu0 %v3910_v13  ;;  %2587 = vmatprep.subr.bf16.mxu1 %v3913_v14  ;;  %v3991_v12 = vld [vmem:[#allocation8 + $0xc8] sm:$0xff]  }
 0x201   :  { %v3992_v13 = vld [vmem:[#allocation8 + $0x8] sm:$0xff]  }
 0x202   :  { %v3993_v14 = vld [vmem:[#allocation8 + $0x88] sm:$0xff]  }
 0x203   :  { %2502 = vmatpush1.bf16.msra.mxu0 %v3908_v15  ;;  %2588 = vmatpush1.bf16.msra.mxu1 %v3911_v16  ;;  %v3994_v15 = vld [vmem:[#allocation8 + $0x50] sm:$0xff]  }
 0x204   :  { %2503 = vmatprep.subr.bf16.mxu0 %v3916_v17  ;;  %2589 = vmatprep.subr.bf16.mxu1 %v3919_v18  ;;  %v3995_v16 = vld [vmem:[#allocation8 + $0xd0] sm:$0xff]  }
 0x205   :  { %v3996_v17 = vld [vmem:[#allocation8 + $0x10] sm:$0xff]  }
 0x206   :  { %v3997_v18 = vld [vmem:[#allocation8 + $0x90] sm:$0xff]  }
 0x207   :  { %2504 = vmatpush1.bf16.msra.mxu0 %v3914_v19  ;;  %2590 = vmatpush1.bf16.msra.mxu1 %v3917_v20  ;;  %v3998_v19 = vld [vmem:[#allocation8 + $0x58] sm:$0xff]  }
 0x208   :  { %2505 = vmatprep.subr.bf16.mxu0 %v3922_v21  ;;  %2591 = vmatprep.subr.bf16.mxu1 %v3925_v22  ;;  %v3999_v20 = vld [vmem:[#allocation8 + $0xd8] sm:$0xff]   ;;  %v4002_v22 = vld [vmem:[#allocation8 + $0x60] sm:$0xff]  }
 0x209   :  { %v4000_v21 = vld [vmem:[#allocation8 + $0x18] sm:$0xff]  }
 0x20b   :  { %2506 = vmatpush1.bf16.msra.mxu0 %v3920_v23  ;;  %2592 = vmatpush1.bf16.msra.mxu1 %v3923_v24  ;;  %v4003_v23 = vld [vmem:[#allocation8 + $0xe0] sm:$0xff]  }
 0x20c   :  { %2507 = vmatprep.subr.bf16.mxu0 %v3928_v25  ;;  %2593 = vmatprep.subr.bf16.mxu1 %v3931_v26  ;;  %v4004_v24 = vld [vmem:[#allocation8 + $0x20] sm:$0xff]   ;;  %v4006_v26 = vld [vmem:[#allocation8 + $0x68] sm:$0xff]  }
 0x20d   :  { %v4005_v25 = vld [vmem:[#allocation8 + $0xa0] sm:$0xff]  }
 0x20f   :  { %2508 = vmatpush1.bf16.msra.mxu0 %v3926_v27  ;;  %2594 = vmatpush1.bf16.msra.mxu1 %v3929_v28  ;;  %v4007_v27 = vld [vmem:[#allocation8 + $0xe8] sm:$0xff]  }
 0x210   :  { %2509 = vmatprep.subr.bf16.mxu0 %v3934_v32  ;;  %2595 = vmatprep.subr.bf16.mxu1 %v3937_v35  ;;  %v4008_v28 = vld [vmem:[#allocation8 + $0x28] sm:$0xff]   ;;  %v4010_v35 = vld [vmem:[#allocation8 + $0x70] sm:$0xff]  }
 0x211   :  { %v4009_v32 = vld [vmem:[#allocation8 + $0xa8] sm:$0xff]  }
 0x213   :  { %2510 = vmatpush1.bf16.msra.mxu0 %v3932_v36  ;;  %2596 = vmatpush1.bf16.msra.mxu1 %v3935_v37  ;;  %v4011_v36 = vld [vmem:[#allocation8 + $0xf0] sm:$0xff]  }
 0x214   :  { %2511 = vmatprep.subr.bf16.mxu0 %v3940_v38  ;;  %2597 = vmatprep.subr.bf16.mxu1 %v3943_v39  ;;  %v4012_v37 = vld [vmem:[#allocation8 + $0x30] sm:$0xff]   ;;  %v4014_v39 = vld [vmem:[#allocation8 + $0x78] sm:$0xff]  }
 0x215   :  { %v4013_v38 = vld [vmem:[#allocation8 + $0xb0] sm:$0xff]  }
 0x217   :  { %2512 = vmatpush1.bf16.msra.mxu0 %v3938_v40  ;;  %2598 = vmatpush1.bf16.msra.mxu1 %v3941_v41  ;;  %v4015_v40 = vld [vmem:[#allocation8 + $0xf8] sm:$0xff]  }
 0x218   :  { %2513 = vmatprep.subr.bf16.mxu0 %v3946_v42  ;;  %2599 = vmatprep.subr.bf16.mxu1 %v3949_v43  ;;  %v4016_v41 = vld [vmem:[#allocation8 + $0x38] sm:$0xff]   ;;  %v1790_v43 = vld [vmem:[%s4316_s4] sm:$0xf] }
 0x219   :  { %v4017_v42 = vld [vmem:[#allocation8 + $0xb8] sm:$0xff]  }
 0x21b   :  { %2514 = vmatpush1.bf16.msra.mxu0 %v3944_v44  ;;  %2600 = vmatpush1.bf16.msra.mxu1 %v3947_v45  ;;  %v1795_v44 = vrot.slane %v1790_v43, %v304_v30  ;;  %v1803_v45 = vrot.slane %v1790_v43, %v312_v31 }
 0x21c   :  { %2515 = vmatprep.subr.bf16.mxu0 %v3952_v46  ;;  %2601 = vmatprep.subr.bf16.mxu1 %v3955_v47  ;;  %v1799_v46 = vrot.slane %v1790_v43, %v308_v33  ;;  %v1807_v47 = vrot.slane %v1790_v43, %v316_v34 }
 0x21f   :  { %2516 = vmatpush1.bf16.msra.mxu0 %v3950_v48  ;;  %2602 = vmatpush1.bf16.msra.mxu1 %v3953_v49 }
 0x220   :  { %2517 = vmatprep.subr.bf16.mxu0 %v3958_v50  ;;  %2603 = vmatprep.subr.bf16.mxu1 %v3961_v51 }
 0x223   :  { %2518 = vmatpush1.bf16.msra.mxu0 %v3956_v52  ;;  %2604 = vmatpush1.bf16.msra.mxu1 %v3959_v53 }
 0x224   :  { %2519 = vmatprep.subr.bf16.mxu0 %v3964_v54  ;;  %2605 = vmatprep.subr.bf16.mxu1 %v3967_v55 }
 0x227   :  { %2520 = vmatpush1.bf16.msra.mxu0 %v3962_v56  ;;  %2606 = vmatpush1.bf16.msra.mxu1 %v3965_v57 }
 0x228   :  { %2521 = vmatprep.subr.bf16.mxu0 %v3970_v58  ;;  %2607 = vmatprep.subr.bf16.mxu1 %v3973_v59 }
 0x22b   :  { %2522 = vmatpush1.bf16.msra.mxu0 %v3968_v60  ;;  %2608 = vmatpush1.bf16.msra.mxu1 %v3971_v61 }
 0x22c   :  { %2523 = vmatprep.subr.bf16.mxu0 %v3976_v62  ;;  %2609 = vmatprep.subr.bf16.mxu1 %v3979_v63 }
 0x22f   :  { %2524 = vmatpush1.bf16.msra.mxu0 %v3974_v1  ;;  %2610 = vmatpush1.bf16.msra.mxu1 %v3977_v2 }
 0x230   :  { %2525 = vmatprep.subr.bf16.mxu0 %v3982_v3  ;;  %2611 = vmatprep.subr.bf16.mxu1 %v3985_v4 }
 0x233   :  { %2526 = vmatpush1.bf16.msra.mxu0 %v3980_v5  ;;  %2612 = vmatpush1.bf16.msra.mxu1 %v3983_v6 }
 0x234   :  { %3396 = vmatprep.subr.bf16.mxu0 %v3986_v7  ;;  %3418 = vmatprep.subr.bf16.mxu1 %v3987_v8 }
 0x236   :  { %2528 = vmatmul.mubr.bf16.vlgmr.msra.gmra.mrb[4].mxu0 %v4279_v0  ;;  %2614 = vmatmul.mubr.bf16.vlgmr.msra.gmra.mrb[4].mxu1 %v4279_v0  ;;  %v4001_v0 = vld [vmem:[#allocation8 + $0x98] sm:$0xff]  }
 0x237   :  { %3397 = vmatpush3.bf16.msra.mxu0 %v3988_v9  ;;  %3419 = vmatpush3.bf16.msra.mxu1 %v3989_v10  ;;  %v3354_v10 = vld [vmem:[%s4318_s6] ss:$0 sm:$0xff]  ;;  %s4155_s6 = smov [#allocation10]  }
 0x238   :  { %3398 = vmatprep.subr.bf16.mxu0 %v3990_v11  ;;  %3420 = vmatprep.subr.bf16.mxu1 %v3991_v12  ;;  %s3014_s8 = sshll.u32 %s4155_s6, 4  ;;  %s3015_s8 = int_to_ptr.vmem [resolvable:$true] %s3014_s8 }
 0x239   :  { %s4114_s9 = scalar_lea.vmem %s3015_s8, 128  ;;  %p4119_p5 = scmp.lt.s32.totalorder %s3015_s8, %s3015_s8 }
 0x23a   :  { %p4115_p4 = scmp.ne.s32.totalorder %s3015_s8, %s4114_s9  ;;  %p4120_p6 = scmp.lt.s32.totalorder %s4114_s9, %s4114_s9 }
 0x23b   :  { %3399 = vmatpush3.bf16.msra.mxu0 %v3992_v13  ;;  %3421 = vmatpush3.bf16.msra.mxu1 %v3993_v14 }
 0x23c   :  { %3400 = vmatprep.subr.bf16.mxu0 %v3994_v15  ;;  %3422 = vmatprep.subr.bf16.mxu1 %v3995_v16  ;;  %p4121_p7 = por %p4120_p6, %p4119_p5 }
 0x23e   :  { %p4122_p8 = pnand %p4121_p7, %p4115_p4 }
 0x23f   :  { %3401 = vmatpush3.bf16.msra.mxu0 %v3996_v17  ;;  %3423 = vmatpush3.bf16.msra.mxu1 %v3997_v18 }
 0x240   :  { %3402 = vmatprep.subr.bf16.mxu0 %v3998_v19  ;;  %3424 = vmatprep.subr.bf16.mxu1 %v3999_v20 }
 0x243   :  { %3403 = vmatpush3.bf16.msra.mxu0 %v4000_v21  ;;  %3425 = vmatpush3.bf16.msra.mxu1 %v4001_v0 }
 0x244   :  { %3404 = vmatprep.subr.bf16.mxu0 %v4002_v22  ;;  %3426 = vmatprep.subr.bf16.mxu1 %v4003_v23 }
 0x247   :  { %3405 = vmatpush3.bf16.msra.mxu0 %v4004_v24  ;;  %3427 = vmatpush3.bf16.msra.mxu1 %v4005_v25 }
 0x248   :  { %3406 = vmatprep.subr.bf16.mxu0 %v4006_v26  ;;  %3428 = vmatprep.subr.bf16.mxu1 %v4007_v27 }
 0x24b   :  { %3407 = vmatpush3.bf16.msra.mxu0 %v4008_v28  ;;  %3429 = vmatpush3.bf16.msra.mxu1 %v4009_v32 }
 0x24c   :  { %3408 = vmatprep.subr.bf16.mxu0 %v4010_v35  ;;  %3430 = vmatprep.subr.bf16.mxu1 %v4011_v36 }
 0x24f   :  { %3409 = vmatpush3.bf16.msra.mxu0 %v4012_v37  ;;  %3431 = vmatpush3.bf16.msra.mxu1 %v4013_v38 }
 0x250   :  { %3410 = vmatprep.subr.bf16.mxu0 %v4014_v39  ;;  %3432 = vmatprep.subr.bf16.mxu1 %v4015_v40 }
 0x253   :  { %3411 = vmatpush3.bf16.msra.mxu0 %v4016_v41  ;;  %3433 = vmatpush3.bf16.msra.mxu1 %v4017_v42 }
 0x309   :  { %v2529_v48 = vpop.f32.mrb[4].mxu0  ;;  %v2615_v49 = vpop.f32.mrb[4].mxu1 }
 0x30a   :  { %v3448_v50 = vadd.f32 %v2529_v48, %v1795_v44  ;;  %v3452_v51 = vadd.f32 %v2615_v49, %v1803_v45  ;;  %v2531_v52 = vpop.f32.mrb[5].mxu0  ;;  %v2617_v53 = vpop.f32.mrb[5].mxu1 }
 0x30b   :  { %v3449_v54 = vadd.f32 %v2531_v52, %v1799_v46  ;;  %v3453_v55 = vadd.f32 %v2617_v53, %v1807_v47  ;;  %v2533_v56 = vpop.f32.mrb[6].mxu0  ;;  %v2619_v57 = vpop.f32.mrb[6].mxu1 }
 0x30c   :  { %v3450_v30 = vadd.f32 %v2533_v56, %v1795_v44  ;;  %v3454_v58 = vadd.f32 %v2619_v57, %v1803_v45  ;;  %v2535_v59 = vpop.f32.mrb[7].mxu0  ;;  %v2621_v31 = vpop.f32.mrb[7].mxu1  ;;  %v2624_v33 = vmax.f32 %v3448_v50, 0.0  ;;  %v2626_v62 = vmax.f32 %v3452_v51, 0.0 }
 0x30d   :  { %v3451_v60 = vadd.f32 %v2535_v59, %v1799_v46  ;;  %v3455_v61 = vadd.f32 %v2621_v31, %v1807_v47  ;;  %v2625_v63 = vmax.f32 %v3449_v54, 0.0  ;;  %v2627_v1 = vmax.f32 %v3453_v55, 0.0 }
 0x30e   :  { %v2628_v29 = vmax.f32 %v3450_v30, 0.0  ;;  %v2630_v34 = vmax.f32 %v3454_v58, 0.0 }
 0x30f   :  { %v2629_v2 = vmax.f32 %v3451_v60, 0.0  ;;  %v2631_v3 = vmax.f32 %v3455_v61, 0.0 }
 0x310   :  { %v2632_v4 = vpack.c.bf16 %v2628_v29, %v2624_v33  ;;  %v2634_v5 = vpack.c.bf16 %v2630_v34, %v2626_v62 }
 0x311   :  { %v2633_v6 = vpack.c.bf16 %v2629_v2, %v2625_v63  ;;  %v2635_v7 = vpack.c.bf16 %v2631_v3, %v2627_v1 }
 0x313   :  { %2931 = vmatprep.mubr.bf16.mxu0 %v2633_v6  ;;  %2972 = vmatprep.mubr.bf16.mxu1 %v2635_v7 }
 0x314   :  { %2932 = vmatmul.mubr.bf16.vlgmr.msra.gmra.mrb[8].mxu0 %v2632_v4  ;;  %2973 = vmatmul.mubr.bf16.vlgmr.msra.gmra.mrb[8].mxu1 %v2634_v5 }
 0x3e7   :  { %v3412_v8 = vpop.f32.mrb[8].mxu0  ;;  %v3434_v9 = vpop.f32.mrb[8].mxu1 }
 0x3e8   :  { %v3413_v11 = vpop.f32.mrb[9].mxu0  ;;  %v3435_v12 = vpop.f32.mrb[9].mxu1 }
 0x3e9   :  { %v3414_v13 = vadd.f32 %v3413_v11, %v3412_v8  ;;  %v3436_v14 = vadd.f32 %v3435_v12, %v3434_v9  ;;  %v3415_v15 = vpop.f32.mrb[10].mxu0  ;;  %v3437_v16 = vpop.f32.mrb[10].mxu1 }
 0x3ea   :  { %v3416_v17 = vpop.f32.mrb[11].mxu0  ;;  %v3438_v18 = vpop.f32.mrb[11].mxu1 }
 0x3eb   :  { %v2934_v19 = vadd.f32 %v3414_v13, %v3354_v10  ;;  %v3417_v20 = vadd.f32 %v3416_v17, %v3415_v15  ;;  %v3439_v21 = vadd.f32 %v3438_v18, %v3437_v16 }
 0x3ed   :  { %v2937_v0 = vadd.f32 %v3417_v20, %v3354_v10  ;;  %v2975_v22 = vadd.f32 %v3436_v14, %v2934_v19 }
 0x3ef   :  { %2981 = vmax.xlane.f32.xlu0 %v2975_v22  ;;  %v2978_v23 = vadd.f32 %v3439_v21, %v2937_v0 }
 0x3f3   :  { %2983 = vmax.xlane.f32.xlu0 %v2978_v23 }
 0x47c   :  { %v2982_v24 = vpop.xlane.xlu0 %2981 }
 0x47d   :  { %v2985_v25 = vsub.f32 %v2975_v22, %v2982_v24 }
 0x47f   :  { %v2987_v26 = vmul.f32 1.442695, %v2985_v25 }
 0x480   :  { %v2984_v27 = vpop.xlane.xlu0 %2983 }
 0x481   :  { %4018 = vpow2.f32 %v2987_v26  ;;  %v2986_v28 = vsub.f32 %v2978_v23, %v2984_v27 }
 0x483   :  { %v2989_v32 = vmul.f32 1.442695, %v2986_v28 }
 0x485   :  { %4020 = vpow2.f32 %v2989_v32 }
 0x48b   :  { %v4019_v35 = vpop.eup %4018 }
 0x48c   :  { %2991 = vadd.xlane.f32.xlu1 %v4019_v35 }
 0x48f   :  { %v4021_v36 = vpop.eup %4020 }
 0x490   :  { %2993 = vadd.xlane.f32.xlu1 %v4021_v36 }
 0x519   :  { %v2992_v37 = vpop.xlane.xlu1 %2991 }
 0x51a   :  { %4022 = vrcp.f32 %v2992_v37 }
 0x51d   :  { %v2994_v38 = vpop.xlane.xlu1 %2993 }
 0x51e   :  { %4024 = vrcp.f32 %v2994_v38 }
 0x524   :  { %v4023_v39 = vpop.eup %4022 }
 0x525   :  { %v2997_v41 = vmul.f32 %v4023_v39, %v4019_v35 }
 0x528   :  { %v4025_v40 = vpop.eup %4024 }
 0x529   :  { %v2998_v42 = vmul.f32 %v4025_v40, %v4021_v36 }
 0x52b   :  { %v3394_v43 = vpack.c.bf16 %v2998_v42, %v2997_v41 }
 0x52d   :  { %3395 = vst [vmem:[#allocation10] sm:$0xff] %v3394_v43  }
 0x52e   :  { %4125 = shalt.err (!%p4122_p8)
}
 0x52f   :  { %s4126_s14 = scalar_lea.hbm %s4319_s7, 128 }
 0x530   :  { %p4127_p9 = scmp.ne.s32.totalorder %s4319_s7, %s4126_s14  ;;  %p4130_p10 = scmp.lt.u32.totalorder %s4126_s14, %s4319_s7 }
 0x532   :  { %p4132_p11 = pnand %p4130_p10, %p4127_p9 }
 0x534   :  { %4135 = shalt.err (!%p4132_p11)
}
 0x535   :  { %3020 = dma.vmem_to_hbm [thread:$0]  %s3015_s8, 128, %s4319_s7, [#allocation4], %s4152_s3, %s4152_s3, %s4153_s11  }
 0x536   :  { %4142 = dma.done.wait [#allocation4], 128  }
 0x537   :  { %4143 = vsyncadd [#allocation4], 4294967168 }
 0x538   :  { %3024 = vsyncpa [#allocation3], 1 }
 0x539   :  { %3025 = vsyncpa [#allocation6], 1 }
 0x53a   :  { %3026 = vsyncpa [#allocation9], 1 }
 0x53b   :  { %3027 = vsyncpa [#allocation4], 1 }

</bundles_post_ra>
